<compile_context>
chip_gen: v7x
topology: tpu7x:2x2x1
jax: 0.10.0
libtpu: 0.0.40
codegen_flags: <defaults>
</compile_context>

<pallas_src>
import functools

import jax
import jax.numpy as jnp
from jax import lax
from jax.experimental import pallas as pl
from jax.experimental.pallas import tpu as pltpu

ASPP_CH = 256   # output channels of each _AsppBlock (hard-coded 256 in the PyTorch code)
OUT_CH = 256    # out_channels; must be 256 for the concat / conv1 shapes to agree
BN_EPS = 1e-5
DILATIONS = (6, 12, 18)


def _aspp_kernel(taps_ref, pool_ref, wb_ref, wf_ref, out_ref):
    """One (batch, spatial-tile) step: two fused GEMMs + broadcast-add + ReLU."""
    taps = taps_ref[0]                                                   # (tile, Kpad) bf16
    # All four conv branches' pre-activations at once (block-diagonal weight).
    pre = jnp.dot(taps, wb_ref[...], preferred_element_type=jnp.float32)  # (tile, 1024) f32
    act = jnp.maximum(pre, 0.0).astype(jnp.bfloat16)     # ReLU distributes over the concat
    # Final 1x1 conv over the concatenated branch activations.
    acc = jnp.dot(act, wf_ref[...], preferred_element_type=jnp.float32)   # (tile, 256) f32
    acc = acc + pool_ref[0]                              # image-pooling branch (1,256) row
    out_ref[0] = jnp.maximum(acc, 0.0).astype(out_ref.dtype)


def _spatial_tile(hw):
    """Largest row-tile <= 512 dividing HW while keeping >= 2 spatial tiles."""
    for t in (512, 256, 128, 64, 32, 16, 8):
        if hw % t == 0 and hw // t >= 2:
            return t
    return hw


@functools.partial(jax.jit, static_argnames=("out_dtype",))
def aspp_forward(x_nchw, params, out_dtype=jnp.bfloat16):
    x = jnp.transpose(x_nchw, (0, 2, 3, 1)).astype(jnp.float32)   # NCHW -> NHWC
    B, H, W, Cin = x.shape
    HW = H * W
    bn = jnp.float32(1.0 / (1.0 + BN_EPS) ** 0.5)   # inference BN with identity stats

    # ---- wrapper-side im2col: 1x1 tap + 27 dilated taps, channel-concatenated ----
    taps = [x]
    for d in DILATIONS:
        xp = jnp.pad(x, ((0, 0), (d, d), (d, d), (0, 0)))
        for kh in range(3):
            for kw in range(3):
                taps.append(lax.slice(xp, (0, kh * d, kw * d, 0),
                                      (B, kh * d + H, kw * d + W, Cin)))
    k_tot = (1 + 9 * len(DILATIONS)) * Cin                    # 28*Cin (= 112 at Cin=4)
    k_pad = -(-k_tot // 128) * 128                            # lane-align the GEMM K dim
    taps = jnp.concatenate(taps, axis=-1).reshape(B, HW, k_tot)
    taps = jnp.pad(taps, ((0, 0), (0, 0), (0, k_pad - k_tot))).astype(jnp.bfloat16)

    # ---- block-diagonal branch weight (Kpad, 4*256), BN folded, bf16 ----
    wb = jnp.zeros((k_pad, 4 * ASPP_CH), jnp.float32)
    wb = wb.at[:Cin, :ASPP_CH].set(params['w1'].reshape(ASPP_CH, Cin).T)
    off = Cin
    for bi, key in enumerate(('w6', 'w12', 'w18'), start=1):
        wg = params[key].transpose(2, 3, 1, 0).reshape(9 * Cin, ASPP_CH)   # (kh,kw,c) rows
        wb = wb.at[off:off + 9 * Cin, bi * ASPP_CH:(bi + 1) * ASPP_CH].set(wg)
        off += 9 * Cin
    wb = (wb * bn).astype(jnp.bfloat16)

    # ---- final 1x1 conv weight (final BN folded): (256, 1280) -> (1280, 256) ----
    wfk = params['wf'].reshape(OUT_CH, 4 * ASPP_CH + OUT_CH).T * bn
    wf_main = wfk[:4 * ASPP_CH].astype(jnp.bfloat16)          # (1024, 256)
    wf_pool = wfk[4 * ASPP_CH:]                               # (256, 256) f32

    # ---- image-pooling branch hoisted out of the kernel (tiny GEMMs, f32) ----
    # bilinear upsample of a 1x1 map with align_corners=True == constant broadcast,
    # so its final-conv contribution is a single (1, 256) row added to every pixel.
    wpk = params['wp'].reshape(OUT_CH, Cin).T * bn
    pool = jnp.maximum(jnp.mean(x.reshape(B, HW, Cin), axis=1) @ wpk, 0.0)   # (B, 256)
    pool_contrib = (pool @ wf_pool).reshape(B, 1, OUT_CH)                    # (B,1,256) f32

    tile = _spatial_tile(HW)
    n_tiles = HW // tile

    flops = 2 * B * HW * (k_pad * 4 * ASPP_CH + 4 * ASPP_CH * OUT_CH)
    out_bytes = B * HW * OUT_CH * jnp.dtype(out_dtype).itemsize
    bytes_accessed = (taps.size * 2 + wb.size * 2 + wf_main.size * 2
                      + pool_contrib.size * 4 + out_bytes)

    out_flat = pl.pallas_call(
        _aspp_kernel,
        out_shape=jax.ShapeDtypeStruct((B, HW, OUT_CH), out_dtype),
        grid=(B, n_tiles),
        in_specs=[
            pl.BlockSpec((1, tile, k_pad), lambda b, s: (b, s, 0)),    # taps (lane-dense)
            pl.BlockSpec((1, 1, OUT_CH), lambda b, s: (b, 0, 0)),      # pooled-branch row
            pl.BlockSpec((k_pad, 4 * ASPP_CH), lambda b, s: (0, 0)),   # block-diag branch W
            pl.BlockSpec((4 * ASPP_CH, OUT_CH), lambda b, s: (0, 0)),  # final 1x1 conv W
        ],
        out_specs=pl.BlockSpec((1, tile, OUT_CH), lambda b, s: (b, s, 0)),
        compiler_params=pltpu.CompilerParams(
            dimension_semantics=("parallel", "parallel"),
            vmem_limit_bytes=32 * 1024 * 1024),
        cost_estimate=pl.CostEstimate(flops=flops, transcendentals=0,
                                      bytes_accessed=bytes_accessed),
    )(taps, pool_contrib, wb, wf_main)

    return out_flat.reshape(B, H, W, OUT_CH).transpose(0, 3, 1, 2)   # back to NCHW


def aspp_reference(x, params):
    """Pure-JAX f32 reference (NCHW, lax convs) mirroring the PyTorch forward."""
    bn = jnp.float32(1.0 / (1.0 + BN_EPS) ** 0.5)

    def conv(v, w, d, pad):
        return lax.conv_general_dilated(
            v, w, window_strides=(1, 1), padding=[(pad, pad), (pad, pad)],
            rhs_dilation=(d, d), dimension_numbers=('NCHW', 'OIHW', 'NCHW'))

    cbr = lambda y: jnp.maximum(y * bn, 0.0)
    a1 = cbr(conv(x, params['w1'], 1, 0))
    a6 = cbr(conv(x, params['w6'], 6, 6))
    a12 = cbr(conv(x, params['w12'], 12, 12))
    a18 = cbr(conv(x, params['w18'], 18, 18))
    xm = jnp.mean(x, axis=(2, 3), keepdims=True)
    imp = cbr(conv(xm, params['wp'], 1, 0))
    imp = jnp.broadcast_to(imp, (x.shape[0], OUT_CH, x.shape[2], x.shape[3]))
    cat = jnp.concatenate([a1, a6, a12, a18, imp], axis=1)
    return cbr(conv(cat, params['wf'], 1, 0))


if __name__ == "__main__":
    B, Cin, H, W = 2, 4, 16, 16

    key = jax.random.PRNGKey(0)
    kx, k1, k6, k12, k18, kp, kf = jax.random.split(key, 7)

    def kaiming(k, shape):  # kaiming_normal_ default: std = sqrt(2 / fan_in)
        fan_in = shape[1] * shape[2] * shape[3]
        return jax.random.normal(k, shape, jnp.float32) * jnp.sqrt(2.0 / fan_in)

    params = {
        'w1':  kaiming(k1,  (ASPP_CH, Cin, 1, 1)),
        'w6':  kaiming(k6,  (ASPP_CH, Cin, 3, 3)),
        'w12': kaiming(k12, (ASPP_CH, Cin, 3, 3)),
        'w18': kaiming(k18, (ASPP_CH, Cin, 3, 3)),
        'wp':  kaiming(kp,  (OUT_CH, Cin, 1, 1)),
        'wf':  kaiming(kf,  (OUT_CH, 4 * ASPP_CH + OUT_CH, 1, 1)),
    }
    x = jax.random.normal(kx, (B, Cin, H, W), jnp.float32)

    out = aspp_forward(x, params)
    jax.block_until_ready(out)
    assert out.shape == (B, OUT_CH, H, W), out.shape

    ref = aspp_reference(x, params)
    scale = float(jnp.max(jnp.abs(ref)))
    err = float(jnp.max(jnp.abs(out.astype(jnp.float32) - ref)))
    # bf16 MXU operands + bf16 output vs f32 reference -> relative tolerance
    assert err < 3e-2 * max(1.0, scale), f"max abs err {err} (ref scale {scale})"

    print("KERNEL_OK")
</pallas_src>

<mosaic_0001>
module attributes {stable_mosaic.version = 11 : i64} {
  func.func @_aspp_kernel(%arg0: i32, %arg1: i32, %arg2: memref<1x128x128xbf16, #tpu.memory_space<vmem>>, %arg3: memref<1x1x256xf32, #tpu.memory_space<vmem>>, %arg4: memref<128x1024xbf16, #tpu.memory_space<vmem>>, %arg5: memref<1024x256xbf16, #tpu.memory_space<vmem>>, %arg6: memref<1x128x256xbf16, #tpu.memory_space<vmem>>) attributes {dimension_semantics = [#tpu.dimension_semantics<parallel>, #tpu.dimension_semantics<parallel>], iteration_bounds = array<i64: 2, 2>, scalar_prefetch = 0 : i64, scratch_operands = 0 : i64, tpu.core_type = #tpu.core_type<tc>, window_params = [{transform_indices = @transform_0, window_bounds = array<i64: 1, 128, 128>}, {transform_indices = @transform_1, window_bounds = array<i64: 1, 1, 256>}, {pipeline_mode = #tpu.pipeline_mode<synchronous>, transform_indices = @transform_2, window_bounds = array<i64: 128, 1024>}, {pipeline_mode = #tpu.pipeline_mode<synchronous>, transform_indices = @transform_3, window_bounds = array<i64: 1024, 256>}, {transform_indices = @transform_4, window_bounds = array<i64: 1, 128, 256>}]} {
    %c0 = arith.constant 0 : index
    %c0_0 = arith.constant 0 : index
    %c0_1 = arith.constant 0 : index
    %0 = vector.load %arg2[%c0, %c0_0, %c0_1] : memref<1x128x128xbf16, #tpu.memory_space<vmem>>, vector<1x128x128xbf16>
    %1 = vector.shape_cast %0 : vector<1x128x128xbf16> to vector<128x128xbf16>
    %c0_2 = arith.constant 0 : index
    %c0_3 = arith.constant 0 : index
    %2 = vector.load %arg4[%c0_2, %c0_3] : memref<128x1024xbf16, #tpu.memory_space<vmem>>, vector<128x1024xbf16>
    %cst = arith.constant dense<0.000000e+00> : vector<128x1024xf32>
    %3 = tpu.matmul %1, %2, %cst {dimension_numbers = #tpu.dot_dimension_numbers<[1], [0], [0], [1], [0, 0, 1, 1], [], []>} : vector<128x128xbf16>, vector<128x1024xbf16>, vector<128x1024xf32> -> vector<128x1024xf32>
    %cst_4 = arith.constant 0.000000e+00 : f32
    %4 = vector.broadcast %cst_4 : f32 to vector<128x1024xf32>
    %5 = arith.maximumf %3, %4 : vector<128x1024xf32>
    %6 = arith.truncf %5 : vector<128x1024xf32> to vector<128x1024xbf16>
    %c0_5 = arith.constant 0 : index
    %c0_6 = arith.constant 0 : index
    %7 = vector.load %arg5[%c0_5, %c0_6] : memref<1024x256xbf16, #tpu.memory_space<vmem>>, vector<1024x256xbf16>
    %cst_7 = arith.constant dense<0.000000e+00> : vector<128x256xf32>
    %8 = tpu.matmul %6, %7, %cst_7 {dimension_numbers = #tpu.dot_dimension_numbers<[1], [0], [0], [1], [0, 0, 1, 1], [], []>} : vector<128x1024xbf16>, vector<1024x256xbf16>, vector<128x256xf32> -> vector<128x256xf32>
    %c0_8 = arith.constant 0 : index
    %c0_9 = arith.constant 0 : index
    %c0_10 = arith.constant 0 : index
    %9 = vector.load %arg3[%c0_8, %c0_9, %c0_10] : memref<1x1x256xf32, #tpu.memory_space<vmem>>, vector<1x1x256xf32>
    %10 = vector.shape_cast %9 : vector<1x1x256xf32> to vector<1x256xf32>
    %11 = vector.broadcast %10 : vector<1x256xf32> to vector<128x256xf32>
    %12 = arith.addf %8, %11 : vector<128x256xf32>
    %cst_11 = arith.constant 0.000000e+00 : f32
    %13 = vector.broadcast %cst_11 : f32 to vector<128x256xf32>
    %14 = arith.maximumf %12, %13 : vector<128x256xf32>
    %15 = arith.truncf %14 : vector<128x256xf32> to vector<128x256xbf16>
    %c0_12 = arith.constant 0 : index
    %c0_13 = arith.constant 0 : index
    %c0_14 = arith.constant 0 : index
    %16 = vector.load %arg6[%c0_12, %c0_13, %c0_14] : memref<1x128x256xbf16, #tpu.memory_space<vmem>>, vector<1x128x256xbf16>
    %17 = vector.shape_cast %16 : vector<1x128x256xbf16> to vector<128x256xbf16>
    %18 = vector.shape_cast %15 : vector<128x256xbf16> to vector<1x128x256xbf16>
    tpu.vector_store %arg6[%c0_12, %c0_13, %c0_14], %18 {strides = array<i32>} : memref<1x128x256xbf16, #tpu.memory_space<vmem>>, vector<1x128x256xbf16>,
    return
  }
  func.func @transform_0(%arg0: i32, %arg1: i32) -> (i32, i32, i32) {
    %c0_i32 = arith.constant 0 : i32
    %c0_i32_0 = arith.constant 0 : i32
    return %arg0, %arg1, %c0_i32 : i32, i32, i32
  }
  func.func @transform_1(%arg0: i32, %arg1: i32) -> (i32, i32, i32) {
    %c0_i32 = arith.constant 0 : i32
    %c0_i32_0 = arith.constant 0 : i32
    %c0_i32_1 = arith.constant 0 : i32
    return %arg0, %c0_i32, %c0_i32_0 : i32, i32, i32
  }
  func.func @transform_2(%arg0: i32, %arg1: i32) -> (i32, i32) {
    %c0_i32 = arith.constant 0 : i32
    %c0_i32_0 = arith.constant 0 : i32
    %c0_i32_1 = arith.constant 0 : i32
    return %c0_i32, %c0_i32_0 : i32, i32
  }
  func.func @transform_3(%arg0: i32, %arg1: i32) -> (i32, i32) {
    %c0_i32 = arith.constant 0 : i32
    %c0_i32_0 = arith.constant 0 : i32
    %c0_i32_1 = arith.constant 0 : i32
    return %c0_i32, %c0_i32_0 : i32, i32
  }
  func.func @transform_4(%arg0: i32, %arg1: i32) -> (i32, i32, i32) {
    %c0_i32 = arith.constant 0 : i32
    %c0_i32_0 = arith.constant 0 : i32
    return %arg0, %arg1, %c0_i32 : i32, i32, i32
  }
}

</mosaic_0001>

<bundles_post_ra>
// kernel: aspp_forward.1
= control target key start
LH: loop header
LB: loop body
LE: loop exit
PB: predicated region body
PF: predicated region fallthrough
CT: control target
= control target key end

     0   :  { %s4640_s0 = inlined_call_operand.vmem [shape: bf16[2,256,128], index: 0, kind: input, shape index: {}]   ;;  %s4641_s1 = inlined_call_operand.vmem [shape: f32[2,1,256], index: 1, kind: input, shape index: {}]   ;;  %s4642_s2 = inlined_call_operand.vmem [shape: bf16[128,1024], index: 2, kind: input, shape index: {}]   ;;  %s4643_s3 = inlined_call_operand.vmem [shape: bf16[1024,256], index: 3, kind: input, shape index: {}]   ;;  %s4644_s4 = inlined_call_operand.hbm [shape: bf16[2,256,256], index: 4, kind: output, shape index: {}]  }
   0x1   :  { %4645 = sst [smem:[#allocation5_spill]] %s4640_s0 }
   0x2   :  { %9 = vsyncpa [#allocation3], 0 }
   0x3   :  { %11 = vsyncpa [#allocation3 + $0x1], 0  ;;  %s3601_s15 = smov 0   ;;  %s3603_s16 = smov 0  }
   0x4   :  { %s3605_s17 = smov 0   ;;  %s3607_s18 = smov 0  }
   0x5   :  { %s3609_s19 = smov 0   ;;  %s3611_s20 = smov 0  }
   0x6   :  { %s3613_s21 = smov 0   ;;  %s3615_s22 = smov 0  }
   0x7 LB: > { %s2824_s23 = sadd.s32 4294967295, %s3570_s22   ;;  %s2825_s24 = sadd.s32 4294967294, %s3570_s22   ;;  %s3570_s22 = sphi %s3615_s22, %s17_s22   ;;  %s3566_s21 = sphi %s3613_s21, %s4655_s21   ;;  %s3562_s20 = sphi %s3611_s20, %s4654_s20   ;;  %s3558_s19 = sphi %s3609_s19, %s4653_s19   ;;  %s3554_s18 = sphi %s3607_s18, %s4652_s18   ;;  %s3550_s17 = sphi %s3605_s17, %s4651_s17   ;;  %s3546_s16 = sphi %s3603_s16, %s4650_s16   ;;  %s3542_s15 = sphi %s3601_s15, %s4649_s15  }
   0x8   : > { %s26_s25 = sadd.s32 1, %s3562_s20  ;;  %s29_s26 = sadd.s32 1, %s3566_s21 }
   0x9   : > { %p27_p0 = scmp.ge.s32.totalorder %s26_s25, 2  ;;  %p144_p1 = scmp.ne.s32.totalorder %s3550_s17, %s3546_s16 }
   0xa   : > { %p145_p2 = scmp.eq.s32.totalorder %s2824_s23, 3  ;;  %p150_p5 = scmp.ne.s32.totalorder %s3546_s16, %s3542_s15 }
   0xb   : > { %s4657_s25 = smov (%p27_p0, %s26_s25), 0  ;;  %s4659_s26 = smov (!%p27_p0, %s29_s26), %s3566_s21 }
   0xc   : > { %s130_s27 = ssub.s32 %s3562_s20, %s4657_s25  ;;  %p3652_p3 = por %p145_p2, %p144_p1 }
   0xd   : > { %p31_p4 = scmp.ge.s32.totalorder %s4659_s26, 2  ;;  %p151_p6 = scmp.eq.s32.totalorder %s2825_s24, 3 }
   0xe   : > { %p2828_p7 = scmp.ge.s32.totalorder %s3570_s22, 1  ;;  %p195_p9 = scmp.lt.s32.totalorder %s3570_s22, 5 }
   0xf   : > { %s4661_s26 = smov (%p31_p4, %s4659_s26), 0  ;;  %p3661_p8 = por %p151_p6, %p150_p5 }
  0x10   : > { %s129_s30 = ssub.s32 %s3566_s21, %s4661_s26  ;;  %s134_s5 = sadd.s32 1, %s3550_s17 }
  0x11   : > { %s131_s6 = sor.u32 %s130_s27, %s129_s30  ;;  %p196_p10 = pnand %p2828_p7, %p195_p9 }
  0x12   : > { %p132_p11 = scmp.eq.s32.totalorder %s131_s6, 0  ;;  %v261_v0 = vld [vmem:[%s4642_s2] sm:$0xff] (!%p196_p10)  ;;  %s2830_s14 = sshll.u32 (!%p196_p10), %s3554_s18, 4  ;;  %v3572_v6 = vmov (!%p196_p10), 0   ;;  %v263_v26 = vld [vmem:[%s4642_s2 + $0x10] sm:$0xff] (!%p196_p10)  ;;  %v262_v41 = vld [vmem:[%s4642_s2 + $0x8] sm:$0xff] (!%p196_p10) }
  0x13   : > { %199 = sbr.rel (%p196_p10) target bundleno = 759 (0x2f7), region = 36  ;;  %v265_v1 = vld [vmem:[%s4642_s2 + $0x20] sm:$0xff] (!%p196_p10)  ;;  %p230_p12 = scmp.lt.s32.totalorder (!%p196_p10), %s3558_s19, 1  ;;  %725 = vmatprep.mubr.bf16.mxu1 (!%p196_p10), %v3572_v6  ;;  %951 = vmatprep.mubr.bf16.mxu0 (!%p196_p10), %v3572_v6  ;;  %v267_v27 = vld [vmem:[%s4642_s2 + $0x30] sm:$0xff] (!%p196_p10)  ;;  %v266_v42 = vld [vmem:[%s4642_s2 + $0x28] sm:$0xff] (!%p196_p10) }
  0x14   : > { %s3670_s7 = scalar_select %p132_p11, %s3550_s17, %s134_s5  }
  0x15   : > { %v269_v2 = vld [vmem:[%s4642_s2 + $0x40] sm:$0xff] (!%p196_p10)  ;;  %v2843_v3 = vcombine.high (!%p196_p10), %v261_v0, %v265_v1  ;;  %v2842_v4 = vcombine.low (!%p196_p10), %v261_v0, %v265_v1  ;;  %p232_p13 = scmp.lt.s32.totalorder (!%p196_p10), %s2830_s14, 31  ;;  %s4648_s0 = sld [smem:[#allocation5_spill]] (!%p196_p10)  ;;  %v271_v28 = vld [vmem:[%s4642_s2 + $0x50] sm:$0xff] (!%p196_p10)  ;;  %v2847_v31 = vcombine.high (!%p196_p10), %v263_v26, %v267_v27  ;;  %v2846_v32 = vcombine.low (!%p196_p10), %v263_v26, %v267_v27  ;;  %v270_v51 = vld [vmem:[%s4642_s2 + $0x48] sm:$0xff] (!%p196_p10) }
  0x16   : > { %v273_v5 = vld [vmem:[%s4642_s2 + $0x60] sm:$0xff] (!%p196_p10)  ;;  %v275_v29 = vld [vmem:[%s4642_s2 + $0x70] sm:$0xff] (!%p196_p10)  ;;  %v2845_v50 = vcombine.high (!%p196_p10), %v262_v41, %v266_v42  ;;  %v274_v52 = vld [vmem:[%s4642_s2 + $0x68] sm:$0xff] (!%p196_p10)  ;;  %v2844_v58 = vcombine.low (!%p196_p10), %v262_v41, %v266_v42  ;;  %s3573_s6 = smov (!%p196_p10), [#allocation2]  }
  0x17   : > { %v2851_v7 = vcombine.high (!%p196_p10), %v269_v2, %v273_v5  ;;  %v277_v8 = vld [vmem:[%s4642_s2 + $0x80] sm:$0xff] (!%p196_p10)  ;;  %693 = vmatprep.subr.bf16.mxu1 (!%p196_p10), %v2843_v3  ;;  %v2850_v10 = vcombine.low (!%p196_p10), %v269_v2, %v273_v5  ;;  %v2855_v33 = vcombine.high (!%p196_p10), %v271_v28, %v275_v29  ;;  %v279_v35 = vld [vmem:[%s4642_s2 + $0x90] sm:$0xff] (!%p196_p10)  ;;  %919 = vmatprep.subr.bf16.mxu0 (!%p196_p10), %v2847_v31  ;;  %v278_v59 = vld [vmem:[%s4642_s2 + $0x88] sm:$0xff] (!%p196_p10) }
  0x18   : > { %v281_v9 = vld [vmem:[%s4642_s2 + $0xa0] sm:$0xff] (!%p196_p10)  ;;  %694 = vmatpush1.bf16.msra.mxu1 (!%p196_p10), %v2842_v4  ;;  %v283_v36 = vld [vmem:[%s4642_s2 + $0xb0] sm:$0xff] (!%p196_p10)  ;;  %920 = vmatpush1.bf16.msra.mxu0 (!%p196_p10), %v2846_v32  ;;  %v2854_v39 = vcombine.low (!%p196_p10), %v271_v28, %v275_v29  ;;  %v282_v60 = vld [vmem:[%s4642_s2 + $0xa8] sm:$0xff] (!%p196_p10)  ;;  %v2853_v62 = vcombine.high (!%p196_p10), %v270_v51, %v274_v52  ;;  %v2852_v1 = vcombine.low (!%p196_p10), %v270_v51, %v274_v52 }
  0x19   : > { %695 = vmatprep.subr.bf16.mxu1 (!%p196_p10), %v2851_v7  ;;  %v2859_v11 = vcombine.high (!%p196_p10), %v277_v8, %v281_v9  ;;  %v285_v12 = vld [vmem:[%s4642_s2 + $0xc0] sm:$0xff] (!%p196_p10)  ;;  %v2858_v14 = vcombine.low (!%p196_p10), %v277_v8, %v281_v9  ;;  %921 = vmatprep.subr.bf16.mxu0 (!%p196_p10), %v2855_v33  ;;  %v2863_v43 = vcombine.high (!%p196_p10), %v279_v35, %v283_v36  ;;  %v287_v45 = vld [vmem:[%s4642_s2 + $0xd0] sm:$0xff] (!%p196_p10)  ;;  %v286_v2 = vld [vmem:[%s4642_s2 + $0xc8] sm:$0xff] (!%p196_p10) }
  0x1a   : > { %s3695_s8 = scalar_select %p230_p12, %s3558_s19, 1  ;;  %v289_v13 = vld [vmem:[%s4642_s2 + $0xe0] sm:$0xff]  ;;  %v291_v46 = vld [vmem:[%s4642_s2 + $0xf0] sm:$0xff]  ;;  %v2862_v47 = vcombine.low %v279_v35, %v283_v36  ;;  %v290_v3 = vld [vmem:[%s4642_s2 + $0xe8] sm:$0xff]  ;;  %v2861_v9 = vcombine.high %v278_v59, %v282_v60 }
  0x1b   : > { %s4663_s14 = smov (!%p232_p13, %s2830_s14), 31  ;;  %v2867_v15 = vcombine.high %v285_v12, %v289_v13  ;;  %v293_v16 = vld [vmem:[%s4642_s2 + $0x100] sm:$0xff]  ;;  %v2866_v18 = vcombine.low %v285_v12, %v289_v13  ;;  %v2871_v49 = vcombine.high %v287_v45, %v291_v46  ;;  %v295_v53 = vld [vmem:[%s4642_s2 + $0x110] sm:$0xff]  ;;  %v2870_v56 = vcombine.low %v287_v45, %v291_v46  ;;  %v310_v27 = vld [vmem:[%s4642_s2 + $0x188] sm:$0xff] }
  0x1c   : > { %s2831_s9 = sshll.u32 %s3695_s8, 5  ;;  %696 = vmatpush1.bf16.msra.mxu1 %v2850_v10  ;;  %v297_v17 = vld [vmem:[%s4642_s2 + $0x120] sm:$0xff]  ;;  %922 = vmatpush1.bf16.msra.mxu0 %v2854_v39  ;;  %v299_v54 = vld [vmem:[%s4642_s2 + $0x130] sm:$0xff]  ;;  %v2860_v13 = vcombine.low %v278_v59, %v282_v60  ;;  %v314_v28 = vld [vmem:[%s4642_s2 + $0x1a8] sm:$0xff]  ;;  %s2833_s30 = sshll.u32 %s3695_s8, 1 }
  0x1d   : > { %s235_s10 = sadd.s32 %s2831_s9, %s4663_s14  ;;  %697 = vmatprep.subr.bf16.mxu1 %v2859_v11  ;;  %v2875_v19 = vcombine.high %v293_v16, %v297_v17  ;;  %v301_v20 = vld [vmem:[%s4642_s2 + $0x140] sm:$0xff]  ;;  %v2874_v22 = vcombine.low %v293_v16, %v297_v17  ;;  %923 = vmatprep.subr.bf16.mxu0 %v2863_v43  ;;  %v303_v57 = vld [vmem:[%s4642_s2 + $0x150] sm:$0xff]  ;;  %v2879_v63 = vcombine.high %v295_v53, %v299_v54  ;;  %v318_v31 = vld [vmem:[%s4642_s2 + $0x1c8] sm:$0xff]  ;;  %s242_s9 = scalar_lea.vmem %s4641_s1, %s2833_s30 }
  0x1e   : > { %s2832_s24 = sshll.u32 %s235_s10, 2  ;;  %v305_v21 = vld [vmem:[%s4642_s2 + $0x160] sm:$0xff]  ;;  %v307_v61 = vld [vmem:[%s4642_s2 + $0x170] sm:$0xff]  ;;  %v2878_v0 = vcombine.low %v295_v53, %v299_v54  ;;  %v2869_v16 = vcombine.high %v286_v2, %v290_v3  ;;  %v322_v32 = vld [vmem:[%s4642_s2 + $0x1e8] sm:$0xff]  ;;  %v2892_v35 = vcombine.low %v310_v27, %v314_v28  ;;  %s3053_s10 = sshll.u32 %s3558_s19, 6 }
  0x1f   : > { %s3707_s5 = scalar_lea.vmem %s4648_s0, %s2832_s24  ;;  %v2883_v23 = vcombine.high %v301_v20, %v305_v21  ;;  %v309_v24 = vld [vmem:[%s4642_s2 + $0x180] sm:$0xff]  ;;  %v2882_v30 = vcombine.low %v301_v20, %v305_v21  ;;  %v2887_v4 = vcombine.high %v303_v57, %v307_v61  ;;  %v311_v5 = vld [vmem:[%s4642_s2 + $0x190] sm:$0xff]  ;;  %v2886_v10 = vcombine.low %v303_v57, %v307_v61  ;;  %v302_v20 = vld [vmem:[%s4642_s2 + $0x148] sm:$0xff]  ;;  %s226_s0 = sand.u32 1, %s3546_s16  }
  0x20   : > { %698 = vmatpush1.bf16.msra.mxu1 %v2858_v14  ;;  %v313_v25 = vld [vmem:[%s4642_s2 + $0x1a0] sm:$0xff]  ;;  %924 = vmatpush1.bf16.msra.mxu0 %v2862_v47  ;;  %v315_v7 = vld [vmem:[%s4642_s2 + $0x1b0] sm:$0xff]  ;;  %v3805_v8 = vld [vmem:[%s3707_s5 + $0x8] sm:$0xff]   ;;  %v2900_v39 = vcombine.low %v318_v31, %v322_v32  ;;  %s2829_s8 = sshll.u32 %s226_s0, 7  ;;  %s4588_s27 = scalar_lea.sflag [#allocation3], %s226_s0 }
  0x21   : > { %699 = vmatprep.subr.bf16.mxu1 %v2867_v15  ;;  %v2891_v34 = vcombine.high %v309_v24, %v313_v25  ;;  %v317_v37 = vld [vmem:[%s4642_s2 + $0x1c0] sm:$0xff]  ;;  %v2890_v40 = vcombine.low %v309_v24, %v313_v25  ;;  %925 = vmatprep.subr.bf16.mxu0 %v2871_v49  ;;  %v319_v11 = vld [vmem:[%s4642_s2 + $0x1d0] sm:$0xff]  ;;  %v294_v14 = vld [vmem:[%s4642_s2 + $0x108] sm:$0xff]  ;;  %v2895_v17 = vcombine.high %v311_v5, %v315_v7  ;;  %s4506_s11 = scalar_lea.vmem [#allocation2], %s2829_s8  ;;  %s3480_s14 = sshll.u32 %s3573_s6, 4  ;;  %s3481_s14 = int_to_ptr.vmem [resolvable:$false] %s3480_s14 }
  0x22   : > { %v321_v38 = vld [vmem:[%s4642_s2 + $0x1e0] sm:$0xff]  ;;  %v323_v12 = vld [vmem:[%s4642_s2 + $0x1f0] sm:$0xff]  ;;  %v298_v15 = vld [vmem:[%s4642_s2 + $0x128] sm:$0xff]  ;;  %s2730_s19 = sshll.u32 %s4506_s11, 4  ;;  %s4582_s19 = int_to_ptr.vmem [resolvable:$true] %s2730_s19 }
  0x23   : > { %v2899_v44 = vcombine.high %v317_v37, %v321_v38  ;;  %v2898_v48 = vcombine.low %v317_v37, %v321_v38  ;;  %v3776_v55 = vld [vmem:[%s3707_s5] sm:$0xff]   ;;  %v306_v21 = vld [vmem:[%s4642_s2 + $0x168] sm:$0xff]  ;;  %v2877_v24 = vcombine.high %v294_v14, %v298_v15  ;;  %v2902_v25 = vcombine.low %v319_v11, %v323_v12  ;;  %v3845_v33 = vld [vmem:[%s3707_s5 + $0x18] sm:$0xff]   ;;  %s3476_s30 = scalar_lea.vmem %s4582_s19, 2048  ;;  %p3483_p4 = scmp.lt.s32.totalorder %s4582_s19, %s3481_s14 }
  0x24   : > { %700 = vmatpush1.bf16.msra.mxu1 %v2866_v18  ;;  %926 = vmatpush1.bf16.msra.mxu0 %v2870_v56  ;;  %v2894_v18 = vcombine.low %v311_v5, %v315_v7  ;;  %v2876_v26 = vcombine.low %v294_v14, %v298_v15  ;;  %v2885_v29 = vcombine.high %v302_v20, %v306_v21  ;;  %v264_v36 = vld [vmem:[%s4642_s2 + $0x18] sm:$0xff]  ;;  %v3865_v42 = vld [vmem:[%s3707_s5 + $0x28] sm:$0xff]   ;;  %v3872_v43 = vld [vmem:[%s3707_s5 + $0x30] sm:$0xff]   ;;  %p3477_p0 = scmp.ne.s32.totalorder %s4582_s19, %s3476_s30 }
  0x25   : > { %701 = vmatprep.subr.bf16.mxu1 %v2875_v19  ;;  %927 = vmatprep.subr.bf16.mxu0 %v2879_v63  ;;  %v2868_v19 = vcombine.low %v286_v2, %v290_v3  ;;  %v268_v37 = vld [vmem:[%s4642_s2 + $0x38] sm:$0xff]  ;;  %v2901_v38 = vcombine.high %v318_v31, %v322_v32  ;;  %v3334_v14 = vld [vmem:[%s4643_s3 + $0x104] ss:$8 sps:$4 sm:$0xff]   ;;  %v3332_v15 = vld [vmem:[%s4643_s3 + $0x100] ss:$8 sps:$4 sm:$0xff]  }
  0x26   : > { %v2849_v41 = vcombine.high %v264_v36, %v268_v37  ;;  %v272_v45 = vld [vmem:[%s4642_s2 + $0x58] sm:$0xff]  ;;  %v2848_v47 = vcombine.low %v264_v36, %v268_v37  ;;  %v3358_v31 = vld [vmem:[%s4643_s3 + $0x184] ss:$8 sps:$4 sm:$0xff]   ;;  %v3356_v32 = vld [vmem:[%s4643_s3 + $0x180] ss:$8 sps:$4 sm:$0xff]   ;;  %p3478_p1 = pnand %p3477_p0, %p3652_p3 }
  0x27   : > { %v276_v46 = vld [vmem:[%s4642_s2 + $0x78] sm:$0xff] }
  0x28   : > { %702 = vmatpush1.bf16.msra.mxu1 %v2874_v22  ;;  %928 = vmatpush1.bf16.msra.mxu0 %v2878_v0  ;;  %v2903_v22 = vcombine.high %v319_v11, %v323_v12  ;;  %v280_v49 = vld [vmem:[%s4642_s2 + $0x98] sm:$0xff]  ;;  %v2856_v51 = vcombine.low %v272_v45, %v276_v46  ;;  %p3479_p2 = pneg %p3478_p1 }
  0x29   : > { %703 = vmatprep.subr.bf16.mxu1 %v2883_v23  ;;  %929 = vmatprep.subr.bf16.mxu0 %v2887_v4  ;;  %v3828_v23 = vld [vmem:[%s3707_s5 + $0x10] sm:$0xff]   ;;  %v288_v53 = vld [vmem:[%s4642_s2 + $0xd8] sm:$0xff] }
  0x2a   : > { %v292_v54 = vld [vmem:[%s4642_s2 + $0xf8] sm:$0xff] }
  0x2b   : > { %v2873_v57 = vcombine.high %v288_v53, %v292_v54  ;;  %v300_v59 = vld [vmem:[%s4642_s2 + $0x138] sm:$0xff]  ;;  %v2872_v60 = vcombine.low %v288_v53, %v292_v54 }
  0x2c   : > { %704 = vmatpush1.bf16.msra.mxu1 %v2882_v30  ;;  %930 = vmatpush1.bf16.msra.mxu0 %v2886_v10  ;;  %v2884_v30 = vcombine.low %v302_v20, %v306_v21  ;;  %v308_v63 = vld [vmem:[%s4642_s2 + $0x178] sm:$0xff] }
  0x2d   : > { %705 = vmatprep.subr.bf16.mxu1 %v2891_v34  ;;  %931 = vmatprep.subr.bf16.mxu0 %v2895_v17  ;;  %v2893_v34 = vcombine.high %v310_v27, %v314_v28  ;;  %v312_v2 = vld [vmem:[%s4642_s2 + $0x198] sm:$0xff]  ;;  %v3352_v27 = vld [vmem:[%s4643_s3 + $0x164] ss:$8 sps:$4 sm:$0xff]   ;;  %v3350_v28 = vld [vmem:[%s4643_s3 + $0x160] ss:$8 sps:$4 sm:$0xff]  }
  0x2e   : > { %v316_v3 = vld [vmem:[%s4642_s2 + $0x1b8] sm:$0xff] }
  0x2f   : > { %v2897_v5 = vcombine.high %v312_v2, %v316_v3  ;;  %v320_v7 = vld [vmem:[%s4642_s2 + $0x1d8] sm:$0xff]  ;;  %v2896_v10 = vcombine.low %v312_v2, %v316_v3  ;;  %v3382_v2 = vld [vmem:[%s4643_s3 + $0x204] ss:$8 sps:$4 sm:$0xff]  }
  0x30   : > { %706 = vmatpush1.bf16.msra.mxu1 %v2890_v40  ;;  %932 = vmatpush1.bf16.msra.mxu0 %v2894_v18  ;;  %v3858_v40 = vld [vmem:[%s3707_s5 + $0x20] sm:$0xff]   ;;  %v3335_v17 = vld [vmem:[%s4643_s3 + $0x110] ss:$8 sps:$4 sm:$0xff]   ;;  %v3343_v20 = vld [vmem:[%s4643_s3 + $0x134] ss:$8 sps:$4 sm:$0xff]  }
  0x31   : > { %707 = vmatprep.subr.bf16.mxu1 %v2899_v44  ;;  %933 = vmatprep.subr.bf16.mxu0 %v2903_v22  ;;  %v3880_v44 = vld [vmem:[%s3707_s5 + $0x38] sm:$0xff]   ;;  %v3340_v18 = vld [vmem:[%s4643_s3 + $0x124] ss:$8 sps:$4 sm:$0xff]   ;;  %s3073_s5 = sshll.u32 %s3554_s18, 5 }
  0x32   : > { %v3341_v21 = vld [vmem:[%s4643_s3 + $0x130] ss:$8 sps:$4 sm:$0xff]   ;;  %v3346_v22 = vld [vmem:[%s4643_s3 + $0x144] ss:$8 sps:$4 sm:$0xff]   ;;  %v3361_v36 = vld [vmem:[%s4643_s3 + $0x194] ss:$8 sps:$4 sm:$0xff]   ;;  %s2727_s12 = sadd.s32 %s3073_s5, %s3053_s10 }
  0x33   : > { %v3359_v37 = vld [vmem:[%s4643_s3 + $0x190] ss:$8 sps:$4 sm:$0xff]   ;;  %v3301_v53 = vld [vmem:[%s4643_s3 + $0x54] ss:$8 sps:$4 sm:$0xff]   ;;  %s3054_s18 = sshll.u32 %s2727_s12, 6 }
  0x34   : > { %708 = vmatpush1.bf16.msra.mxu1 %v2898_v48  ;;  %934 = vmatpush1.bf16.msra.mxu0 %v2902_v25  ;;  %v2857_v48 = vcombine.high %v272_v45, %v276_v46  ;;  %v3349_v25 = vld [vmem:[%s4643_s3 + $0x154] ss:$8 sps:$4 sm:$0xff]   ;;  %v3290_v45 = vld [vmem:[%s4643_s3 + $0x20] ss:$8 sps:$4 sm:$0xff]   ;;  %s4580_s24 = scalar_lea.hbm %s4644_s4, %s3054_s18 }
  0x35   : > { %806 = vmatprep.subr.bf16.mxu1 %v2845_v50  ;;  %v284_v50 = vld [vmem:[%s4642_s2 + $0xb8] sm:$0xff]  ;;  %2230 = vmatprep.subr.bf16.mxu0 %v3334_v14  ;;  %v3326_v14 = vld [vmem:[%s4643_s3 + $0xe0] ss:$8 sps:$4 sm:$0xff]  }
  0x36   : > { %v2865_v52 = vcombine.high %v280_v49, %v284_v50  ;;  %v2864_v56 = vcombine.low %v280_v49, %v284_v50  ;;  %v3295_v46 = vld [vmem:[%s4643_s3 + $0x34] ss:$8 sps:$4 sm:$0xff]   ;;  %v3293_v49 = vld [vmem:[%s4643_s3 + $0x30] ss:$8 sps:$4 sm:$0xff]   ;;  %v3298_v50 = vld [vmem:[%s4643_s3 + $0x44] ss:$8 sps:$4 sm:$0xff]  }
  0x37   : > { %726 = vmatmul.mubr.bf16.vlgmr.msra.gmra.mrb[0].mxu1 %v3776_v55  ;;  %952 = vmatmul.mubr.bf16.vlgmr.msra.gmra.mrb[0].mxu0 %v3776_v55  ;;  %v3373_v54 = vld [vmem:[%s4643_s3 + $0x1d4] ss:$8 sps:$4 sm:$0xff]  }
  0x38   : > { %807 = vmatpush1.bf16.msra.mxu1 %v2844_v58  ;;  %735 = vmatprep.mubr.bf16.mxu1 %v3572_v6  ;;  %v296_v58 = vld [vmem:[%s4642_s2 + $0x118] sm:$0xff] }
  0x39   : > { %808 = vmatprep.subr.bf16.mxu1 %v2853_v62  ;;  %961 = vmatprep.mubr.bf16.mxu0 %v3572_v6  ;;  %v2881_v61 = vcombine.high %v296_v58, %v300_v59  ;;  %v304_v62 = vld [vmem:[%s4642_s2 + $0x158] sm:$0xff]  ;;  %v2880_v0 = vcombine.low %v296_v58, %v300_v59  ;;  %v3304_v58 = vld [vmem:[%s4643_s3 + $0x64] ss:$8 sps:$4 sm:$0xff]  }
  0x3a   : > { %v2888_v4 = vcombine.low %v304_v62, %v308_v63  ;;  %2231 = vmatpush1.bf16.msra.mxu0 %v3332_v15  ;;  %v3376_v59 = vld [vmem:[%s4643_s3 + $0x1e4] ss:$8 sps:$4 sm:$0xff]   ;;  %v3313_v3 = vld [vmem:[%s4643_s3 + $0x94] ss:$8 sps:$4 sm:$0xff]  }
  0x3c   : > { %809 = vmatpush1.bf16.msra.mxu1 %v2852_v1  ;;  %v2889_v1 = vcombine.high %v304_v62, %v308_v63  ;;  %v3379_v62 = vld [vmem:[%s4643_s3 + $0x1f4] ss:$8 sps:$4 sm:$0xff]   ;;  %v3377_v63 = vld [vmem:[%s4643_s3 + $0x1f0] ss:$8 sps:$4 sm:$0xff]  }
  0x3d   : > { %810 = vmatprep.subr.bf16.mxu1 %v2861_v9  ;;  %v324_v9 = vld [vmem:[%s4642_s2 + $0x1f8] sm:$0xff] }
  0x3e   : > { %v2905_v11 = vcombine.high %v320_v7, %v324_v9  ;;  %v2904_v12 = vcombine.low %v320_v7, %v324_v9  ;;  %v3314_v7 = vld [vmem:[%s4643_s3 + $0xa0] ss:$8 sps:$4 sm:$0xff]   ;;  %v3317_v9 = vld [vmem:[%s4643_s3 + $0xb0] ss:$8 sps:$4 sm:$0xff]  }
  0x3f   : > { %736 = vmatmul.mubr.bf16.gmra.mrb[4].mxu1 %v3805_v8  ;;  %962 = vmatmul.mubr.bf16.gmra.mrb[4].mxu0 %v3805_v8 }
  0x40   : > { %745 = vmatprep.mubr.bf16.mxu1 %v3572_v6  ;;  %811 = vmatpush1.bf16.msra.mxu1 %v2860_v13  ;;  %v3286_v13 = vld [vmem:[%s4643_s3 + $0x4] ss:$8 sps:$4 sm:$0xff]  }
  0x41   : > { %812 = vmatprep.subr.bf16.mxu1 %v2869_v16  ;;  %971 = vmatprep.mubr.bf16.mxu0 %v3572_v6  ;;  %v3337_v16 = vld [vmem:[%s4643_s3 + $0x114] ss:$8 sps:$4 sm:$0xff]  }
  0x42   : > { %2232 = vmatprep.subr.bf16.mxu0 %v3337_v16 }
  0x43   : > { %2233 = vmatpush1.bf16.msra.mxu0 %v3335_v17 }
  0x44   : > { %813 = vmatpush1.bf16.msra.mxu1 %v2868_v19  ;;  %v3338_v19 = vld [vmem:[%s4643_s3 + $0x120] ss:$8 sps:$4 sm:$0xff]   ;;  %2234 = vmatprep.subr.bf16.mxu0 %v3340_v18 }
  0x45   : > { %814 = vmatprep.subr.bf16.mxu1 %v2877_v24  ;;  %v3344_v24 = vld [vmem:[%s4643_s3 + $0x140] ss:$8 sps:$4 sm:$0xff]  }
  0x47   : > { %746 = vmatmul.mubr.bf16.gmra.mrb[8].mxu1 %v3828_v23  ;;  %972 = vmatmul.mubr.bf16.gmra.mrb[8].mxu0 %v3828_v23 }
  0x48   : > { %755 = vmatprep.mubr.bf16.mxu1 %v3572_v6  ;;  %815 = vmatpush1.bf16.msra.mxu1 %v2876_v26  ;;  %v3347_v26 = vld [vmem:[%s4643_s3 + $0x150] ss:$8 sps:$4 sm:$0xff]  }
  0x49   : > { %816 = vmatprep.subr.bf16.mxu1 %v2885_v29  ;;  %981 = vmatprep.mubr.bf16.mxu0 %v3572_v6  ;;  %v3355_v29 = vld [vmem:[%s4643_s3 + $0x174] ss:$8 sps:$4 sm:$0xff]  }
  0x4a   : > { %2235 = vmatpush1.bf16.msra.mxu0 %v3338_v19 }
  0x4b   : > { %2236 = vmatprep.subr.bf16.mxu0 %v3343_v20 }
  0x4c   : > { %817 = vmatpush1.bf16.msra.mxu1 %v2884_v30  ;;  %v3353_v30 = vld [vmem:[%s4643_s3 + $0x170] ss:$8 sps:$4 sm:$0xff]  }
  0x4d   : > { %818 = vmatprep.subr.bf16.mxu1 %v2893_v34  ;;  %v3284_v34 = vld [vmem:[%s4643_s3] ss:$8 sps:$4 sm:$0xff]  }
  0x4e   : > { %2237 = vmatpush1.bf16.msra.mxu0 %v3341_v21 }
  0x4f   : > { %756 = vmatmul.mubr.bf16.gmra.mrb[12].mxu1 %v3845_v33  ;;  %982 = vmatmul.mubr.bf16.gmra.mrb[12].mxu0 %v3845_v33 }
  0x50   : > { %765 = vmatprep.mubr.bf16.mxu1 %v3572_v6  ;;  %819 = vmatpush1.bf16.msra.mxu1 %v2892_v35  ;;  %v3289_v35 = vld [vmem:[%s4643_s3 + $0x14] ss:$8 sps:$4 sm:$0xff]  }
  0x51   : > { %820 = vmatprep.subr.bf16.mxu1 %v2901_v38  ;;  %991 = vmatprep.mubr.bf16.mxu0 %v3572_v6  ;;  %v3287_v38 = vld [vmem:[%s4643_s3 + $0x10] ss:$8 sps:$4 sm:$0xff]  }
  0x52   : > { %2238 = vmatprep.subr.bf16.mxu0 %v3346_v22 }
  0x53   : > { %2239 = vmatpush1.bf16.msra.mxu0 %v3344_v24 }
  0x54   : > { %821 = vmatpush1.bf16.msra.mxu1 %v2900_v39  ;;  %2240 = vmatprep.subr.bf16.mxu0 %v3349_v25  ;;  %v3292_v39 = vld [vmem:[%s4643_s3 + $0x24] ss:$8 sps:$4 sm:$0xff]  }
  0x55   : > { %1032 = vmatprep.subr.bf16.mxu1 %v2849_v41  ;;  %v3364_v41 = vld [vmem:[%s4643_s3 + $0x1a4] ss:$8 sps:$4 sm:$0xff]  }
  0x57   : > { %766 = vmatmul.mubr.bf16.gmra.mrb[16].mxu1 %v3858_v40  ;;  %992 = vmatmul.mubr.bf16.gmra.mrb[16].mxu0 %v3858_v40 }
  0x58   : > { %775 = vmatprep.mubr.bf16.mxu1 %v3572_v6  ;;  %1001 = vmatprep.mubr.bf16.mxu0 %v3572_v6 }
  0x59   : > { %2241 = vmatpush1.bf16.msra.mxu0 %v3347_v26 }
  0x5a   : > { %2242 = vmatprep.subr.bf16.mxu0 %v3352_v27 }
  0x5d   : > { %2243 = vmatpush1.bf16.msra.mxu0 %v3350_v28 }
  0x5e   : > { %2244 = vmatprep.subr.bf16.mxu0 %v3355_v29 }
  0x5f   : > { %776 = vmatmul.mubr.bf16.gmra.mrb[20].mxu1 %v3865_v42  ;;  %1002 = vmatmul.mubr.bf16.gmra.mrb[20].mxu0 %v3865_v42 }
  0x60   : > { %785 = vmatprep.mubr.bf16.mxu1 %v3572_v6  ;;  %1011 = vmatprep.mubr.bf16.mxu0 %v3572_v6 }
  0x61   : > { %2245 = vmatpush1.bf16.msra.mxu0 %v3353_v30 }
  0x62   : > { %2246 = vmatprep.subr.bf16.mxu0 %v3358_v31 }
  0x65   : > { %2247 = vmatpush1.bf16.msra.mxu0 %v3356_v32 }
  0x66   : > { %2248 = vmatprep.subr.bf16.mxu0 %v3361_v36 }
  0x67   : > { %786 = vmatmul.mubr.bf16.gmra.mrb[24].mxu1 %v3872_v43  ;;  %1012 = vmatmul.mubr.bf16.gmra.mrb[24].mxu0 %v3872_v43 }
  0x68   : > { %795 = vmatprep.mubr.bf16.mxu1 %v3572_v6  ;;  %1021 = vmatprep.mubr.bf16.mxu0 %v3572_v6 }
  0x69   : > { %2249 = vmatpush1.bf16.msra.mxu0 %v3359_v37 }
  0x6a   : > { %2250 = vmatprep.subr.bf16.mxu0 %v3364_v41 }
  0x6f   : > { %796 = vmatmul.mubr.bf16.gmra.mrb[28].mxu1 %v3880_v44  ;;  %1022 = vmatmul.mubr.bf16.gmra.mrb[28].mxu0 %v3880_v44 }
  0x70   : > { %838 = vmatprep.mubr.bf16.mxu1 %v3572_v6 }
  0x77   : > { %839 = vmatmul.mubr.bf16.vlgmr.msra.gmra.mrb[32].mxu1 %v3776_v55 }
  0x78   : > { %848 = vmatprep.mubr.bf16.mxu1 %v3572_v6  ;;  %1033 = vmatpush1.bf16.msra.mxu1 %v2848_v47  ;;  %v3367_v47 = vld [vmem:[%s4643_s3 + $0x1b4] ss:$8 sps:$4 sm:$0xff]  }
  0x79   : > { %1034 = vmatprep.subr.bf16.mxu1 %v2857_v48  ;;  %v3365_v48 = vld [vmem:[%s4643_s3 + $0x1b0] ss:$8 sps:$4 sm:$0xff]  }
  0x7c   : > { %1035 = vmatpush1.bf16.msra.mxu1 %v2856_v51  ;;  %v3370_v51 = vld [vmem:[%s4643_s3 + $0x1c4] ss:$8 sps:$4 sm:$0xff]  }
  0x7d   : > { %1036 = vmatprep.subr.bf16.mxu1 %v2865_v52  ;;  %v3296_v52 = vld [vmem:[%s4643_s3 + $0x40] ss:$8 sps:$4 sm:$0xff]  }
  0x7f   : > { %849 = vmatmul.mubr.bf16.gmra.mrb[36].mxu1 %v3805_v8 }
  0x80   : > { %858 = vmatprep.mubr.bf16.mxu1 %v3572_v6  ;;  %1037 = vmatpush1.bf16.msra.mxu1 %v2864_v56  ;;  %v3371_v56 = vld [vmem:[%s4643_s3 + $0x1d0] ss:$8 sps:$4 sm:$0xff]  }
  0x81   : > { %1038 = vmatprep.subr.bf16.mxu1 %v2873_v57  ;;  %v3299_v57 = vld [vmem:[%s4643_s3 + $0x50] ss:$8 sps:$4 sm:$0xff]  }
  0x84   : > { %1039 = vmatpush1.bf16.msra.mxu1 %v2872_v60  ;;  %v3302_v60 = vld [vmem:[%s4643_s3 + $0x60] ss:$8 sps:$4 sm:$0xff]  }
  0x85   : > { %1040 = vmatprep.subr.bf16.mxu1 %v2881_v61  ;;  %v3307_v61 = vld [vmem:[%s4643_s3 + $0x74] ss:$8 sps:$4 sm:$0xff]  }
  0x87   : > { %859 = vmatmul.mubr.bf16.gmra.mrb[40].mxu1 %v3828_v23 }
  0x88   : > { %868 = vmatprep.mubr.bf16.mxu1 %v3572_v6  ;;  %1041 = vmatpush1.bf16.msra.mxu1 %v2880_v0  ;;  %v3305_v0 = vld [vmem:[%s4643_s3 + $0x70] ss:$8 sps:$4 sm:$0xff]  }
  0x89   : > { %1042 = vmatprep.subr.bf16.mxu1 %v2889_v1  ;;  %v3310_v1 = vld [vmem:[%s4643_s3 + $0x84] ss:$8 sps:$4 sm:$0xff]  }
  0x8c   : > { %1043 = vmatpush1.bf16.msra.mxu1 %v2888_v4  ;;  %v3311_v4 = vld [vmem:[%s4643_s3 + $0x90] ss:$8 sps:$4 sm:$0xff]  }
  0x8d   : > { %1044 = vmatprep.subr.bf16.mxu1 %v2897_v5  ;;  %v3316_v5 = vld [vmem:[%s4643_s3 + $0xa4] ss:$8 sps:$4 sm:$0xff]  }
  0x8f   : > { %869 = vmatmul.mubr.bf16.gmra.mrb[44].mxu1 %v3845_v33 }
  0x90   : > { %878 = vmatprep.mubr.bf16.mxu1 %v3572_v6  ;;  %1045 = vmatpush1.bf16.msra.mxu1 %v2896_v10  ;;  %v3322_v10 = vld [vmem:[%s4643_s3 + $0xc4] ss:$8 sps:$4 sm:$0xff]  }
  0x91   : > { %1046 = vmatprep.subr.bf16.mxu1 %v2905_v11  ;;  %v3320_v11 = vld [vmem:[%s4643_s3 + $0xc0] ss:$8 sps:$4 sm:$0xff]  }
  0x94   : > { %1047 = vmatpush1.bf16.msra.mxu1 %v2904_v12  ;;  %v3323_v12 = vld [vmem:[%s4643_s3 + $0xd0] ss:$8 sps:$4 sm:$0xff]  }
  0x95   : > { %2117 = vmatprep.subr.bf16.mxu1 %v3286_v13  ;;  %v3328_v13 = vld [vmem:[%s4643_s3 + $0xe4] ss:$8 sps:$4 sm:$0xff]  }
  0x97   : > { %879 = vmatmul.mubr.bf16.gmra.mrb[48].mxu1 %v3858_v40 }
  0x98   : > { %888 = vmatprep.mubr.bf16.mxu1 %v3572_v6 }
  0x9f   : > { %889 = vmatmul.mubr.bf16.gmra.mrb[52].mxu1 %v3865_v42 }
  0xa0   : > { %898 = vmatprep.mubr.bf16.mxu1 %v3572_v6 }
  0xa7   : > { %899 = vmatmul.mubr.bf16.gmra.mrb[56].mxu1 %v3872_v43 }
  0xa8   : > { %908 = vmatprep.mubr.bf16.mxu1 %v3572_v6 }
  0xaf   : > { %909 = vmatmul.mubr.bf16.gmra.mrb[60].mxu1 %v3880_v44 }
  0xb0   : > { %1064 = vmatprep.mubr.bf16.mxu1 %v3572_v6 }
  0xb7   : > { %1065 = vmatmul.mubr.bf16.vlgmr.msra.gmra.mrb[64].mxu1 %v3776_v55  ;;  %v3362_v55 = vld [vmem:[%s4643_s3 + $0x1a0] ss:$8 sps:$4 sm:$0xff]  }
  0xb8   : > { %2118 = vmatpush1.bf16.msra.mxu1 %v3284_v34  ;;  %1074 = vmatprep.mubr.bf16.mxu1 %v3572_v6 }
  0xb9   : > { %2119 = vmatprep.subr.bf16.mxu1 %v3289_v35  ;;  %2251 = vmatpush1.bf16.msra.mxu0 %v3362_v55 }
  0xba   : > { %2252 = vmatprep.subr.bf16.mxu0 %v3367_v47 }
  0xbc   : > { %2120 = vmatpush1.bf16.msra.mxu1 %v3287_v38 }
  0xbd   : > { %2121 = vmatprep.subr.bf16.mxu1 %v3292_v39  ;;  %2253 = vmatpush1.bf16.msra.mxu0 %v3365_v48 }
  0xbe   : > { %2254 = vmatprep.subr.bf16.mxu0 %v3370_v51 }
  0xbf   : > { %1075 = vmatmul.mubr.bf16.gmra.mrb[68].mxu1 %v3805_v8  ;;  %v3368_v8 = vld [vmem:[%s4643_s3 + $0x1c0] ss:$8 sps:$4 sm:$0xff]  }
  0xc0   : > { %2122 = vmatpush1.bf16.msra.mxu1 %v3290_v45  ;;  %1084 = vmatprep.mubr.bf16.mxu1 %v3572_v6 }
  0xc1   : > { %2123 = vmatprep.subr.bf16.mxu1 %v3295_v46  ;;  %2255 = vmatpush1.bf16.msra.mxu0 %v3368_v8 }
  0xc2   : > { %2256 = vmatprep.subr.bf16.mxu0 %v3373_v54 }
  0xc4   : > { %2124 = vmatpush1.bf16.msra.mxu1 %v3293_v49 }
  0xc5   : > { %2125 = vmatprep.subr.bf16.mxu1 %v3298_v50  ;;  %2257 = vmatpush1.bf16.msra.mxu0 %v3371_v56 }
  0xc6   : > { %2258 = vmatprep.subr.bf16.mxu0 %v3376_v59 }
  0xc7   : > { %1085 = vmatmul.mubr.bf16.gmra.mrb[72].mxu1 %v3828_v23  ;;  %v3374_v23 = vld [vmem:[%s4643_s3 + $0x1e0] ss:$8 sps:$4 sm:$0xff]  }
  0xc8   : > { %2126 = vmatpush1.bf16.msra.mxu1 %v3296_v52  ;;  %1094 = vmatprep.mubr.bf16.mxu1 %v3572_v6 }
  0xc9   : > { %2127 = vmatprep.subr.bf16.mxu1 %v3301_v53  ;;  %2259 = vmatpush1.bf16.msra.mxu0 %v3374_v23 }
  0xca   : > { %2260 = vmatprep.subr.bf16.mxu0 %v3379_v62 }
  0xcc   : > { %2128 = vmatpush1.bf16.msra.mxu1 %v3299_v57 }
  0xcd   : > { %2129 = vmatprep.subr.bf16.mxu1 %v3304_v58  ;;  %2261 = vmatpush1.bf16.msra.mxu0 %v3377_v63 }
  0xce   : > { %2343 = vmatprep.subr.bf16.mxu0 %v3382_v2 }
  0xcf   : > { %1095 = vmatmul.mubr.bf16.gmra.mrb[76].mxu1 %v3845_v33  ;;  %v3308_v33 = vld [vmem:[%s4643_s3 + $0x80] ss:$8 sps:$4 sm:$0xff]  }
  0xd0   : > { %2130 = vmatpush1.bf16.msra.mxu1 %v3302_v60  ;;  %1104 = vmatprep.mubr.bf16.mxu1 %v3572_v6 }
  0xd1   : > { %2131 = vmatprep.subr.bf16.mxu1 %v3307_v61 }
  0xd4   : > { %2132 = vmatpush1.bf16.msra.mxu1 %v3305_v0 }
  0xd5   : > { %2133 = vmatprep.subr.bf16.mxu1 %v3310_v1 }
  0xd7   : > { %1105 = vmatmul.mubr.bf16.gmra.mrb[80].mxu1 %v3858_v40  ;;  %v3319_v40 = vld [vmem:[%s4643_s3 + $0xb4] ss:$8 sps:$4 sm:$0xff]  }
  0xd8   : > { %2134 = vmatpush1.bf16.msra.mxu1 %v3308_v33  ;;  %1114 = vmatprep.mubr.bf16.mxu1 %v3572_v6 }
  0xd9   : > { %2135 = vmatprep.subr.bf16.mxu1 %v3313_v3 }
  0xdc   : > { %2136 = vmatpush1.bf16.msra.mxu1 %v3311_v4 }
  0xdd   : > { %2137 = vmatprep.subr.bf16.mxu1 %v3316_v5 }
  0xdf   : > { %1115 = vmatmul.mubr.bf16.gmra.mrb[84].mxu1 %v3865_v42  ;;  %v3325_v42 = vld [vmem:[%s4643_s3 + $0xd4] ss:$8 sps:$4 sm:$0xff]  }
  0xe0   : > { %2138 = vmatpush1.bf16.msra.mxu1 %v3314_v7  ;;  %1124 = vmatprep.mubr.bf16.mxu1 %v3572_v6 }
  0xe1   : > { %2139 = vmatprep.subr.bf16.mxu1 %v3319_v40 }
  0xe4   : > { %2140 = vmatpush1.bf16.msra.mxu1 %v3317_v9 }
  0xe5   : > { %2141 = vmatprep.subr.bf16.mxu1 %v3322_v10 }
  0xe7   : > { %1125 = vmatmul.mubr.bf16.gmra.mrb[88].mxu1 %v3872_v43  ;;  %v3331_v43 = vld [vmem:[%s4643_s3 + $0xf4] ss:$8 sps:$4 sm:$0xff]  }
  0xe8   : > { %2142 = vmatpush1.bf16.msra.mxu1 %v3320_v11  ;;  %1134 = vmatprep.mubr.bf16.mxu1 %v3572_v6  ;;  %v3329_v6 = vld [vmem:[%s4643_s3 + $0xf0] ss:$8 sps:$4 sm:$0xff]  }
  0xe9   : > { %2143 = vmatprep.subr.bf16.mxu1 %v3325_v42 }
  0xec   : > { %2144 = vmatpush1.bf16.msra.mxu1 %v3323_v12 }
  0xed   : > { %2145 = vmatprep.subr.bf16.mxu1 %v3328_v13 }
  0xef   : > { %1135 = vmatmul.mubr.bf16.gmra.mrb[92].mxu1 %v3880_v44 }
  0xf0   : > { %2146 = vmatpush1.bf16.msra.mxu1 %v3326_v14 }
  0xf1   : > { %2147 = vmatprep.subr.bf16.mxu1 %v3331_v43 }
  0xf4   : > { %2148 = vmatpush1.bf16.msra.mxu1 %v3329_v6 }
 0x10a   : > { %v727_v15 = vpop.f32.mrb[0].mxu1  ;;  %v953_v45 = vpop.f32.mrb[0].mxu0 }
 0x10b   : > { %v729_v16 = vpop.f32.mrb[1].mxu1  ;;  %v1145_v18 = vmax.f32 %v727_v15, 0.0  ;;  %v1149_v48 = vmax.f32 %v953_v45, 0.0  ;;  %v955_v49 = vpop.f32.mrb[1].mxu0 }
 0x10c   : > { %v731_v17 = vpop.f32.mrb[2].mxu1  ;;  %v1146_v21 = vmax.f32 %v729_v16, 0.0  ;;  %v1150_v51 = vmax.f32 %v955_v49, 0.0  ;;  %v957_v8 = vpop.f32.mrb[2].mxu0 }
 0x10d   : > { %v1153_v19 = vmax.f32 %v731_v17, 0.0  ;;  %v733_v20 = vpop.f32.mrb[3].mxu1  ;;  %v1157_v53 = vmax.f32 %v957_v8, 0.0  ;;  %v959_v54 = vpop.f32.mrb[3].mxu0 }
 0x10e   : > { %v1154_v22 = vmax.f32 %v733_v20, 0.0  ;;  %v1158_v56 = vmax.f32 %v959_v54, 0.0 }
 0x10f   : > { %v1273_v24 = vpack.c.bf16 %v1153_v19, %v1145_v18  ;;  %v4158_v58 = vpack.c.bf16 %v1157_v53, %v1149_v48 }
 0x110   : > { %v1274_v25 = vpack.c.bf16 %v1154_v22, %v1146_v21  ;;  %v4160_v23 = vpack.c.bf16 %v1158_v56, %v1150_v51 }
 0x112   : > { %v737_v26 = vpop.f32.mrb[4].mxu1  ;;  %2149 = vmatprep.mubr.bf16.mxu1 %v1274_v25  ;;  %v963_v0 = vpop.f32.mrb[4].mxu0 }
 0x113   : > { %v739_v44 = vpop.f32.mrb[5].mxu1  ;;  %2150 = vmatmul.mubr.bf16.vlgmr.msra.gmra.mrb[96].mxu1 %v1273_v24  ;;  %v1161_v28 = vmax.f32 %v737_v26, 0.0  ;;  %v1165_v33 = vmax.f32 %v963_v0, 0.0  ;;  %v965_v3 = vpop.f32.mrb[5].mxu0 }
 0x114   : > { %v741_v27 = vpop.f32.mrb[6].mxu1  ;;  %v1162_v31 = vmax.f32 %v739_v44, 0.0  ;;  %v1166_v5 = vmax.f32 %v965_v3, 0.0  ;;  %v967_v7 = vpop.f32.mrb[6].mxu0 }
 0x115   : > { %v1169_v29 = vmax.f32 %v741_v27, 0.0  ;;  %v743_v30 = vpop.f32.mrb[7].mxu1  ;;  %v1173_v9 = vmax.f32 %v967_v7, 0.0  ;;  %v969_v10 = vpop.f32.mrb[7].mxu0 }
 0x116   : > { %v1170_v32 = vmax.f32 %v743_v30, 0.0  ;;  %v1174_v11 = vmax.f32 %v969_v10, 0.0 }
 0x117   : > { %v1281_v34 = vpack.c.bf16 %v1169_v29, %v1161_v28  ;;  %v4162_v12 = vpack.c.bf16 %v1173_v9, %v1165_v33 }
 0x118   : > { %v1282_v35 = vpack.c.bf16 %v1170_v32, %v1162_v31  ;;  %v4164_v14 = vpack.c.bf16 %v1174_v11, %v1166_v5 }
 0x11a   : > { %v747_v36 = vpop.f32.mrb[8].mxu1  ;;  %2159 = vmatprep.mubr.bf16.mxu1 %v1282_v35  ;;  %v973_v17 = vpop.f32.mrb[8].mxu0 }
 0x11b   : > { %v749_v37 = vpop.f32.mrb[9].mxu1  ;;  %2160 = vmatmul.mubr.bf16.gmra.mrb[100].mxu1 %v1281_v34  ;;  %v1177_v39 = vmax.f32 %v747_v36, 0.0  ;;  %v1181_v20 = vmax.f32 %v973_v17, 0.0  ;;  %v975_v21 = vpop.f32.mrb[9].mxu0 }
 0x11c   : > { %v751_v38 = vpop.f32.mrb[10].mxu1  ;;  %v1178_v46 = vmax.f32 %v749_v37, 0.0  ;;  %v1182_v24 = vmax.f32 %v975_v21, 0.0  ;;  %v977_v25 = vpop.f32.mrb[10].mxu0 }
 0x11d   : > { %v1185_v41 = vmax.f32 %v751_v38, 0.0  ;;  %v753_v55 = vpop.f32.mrb[11].mxu1  ;;  %v1189_v44 = vmax.f32 %v977_v25, 0.0  ;;  %v979_v27 = vpop.f32.mrb[11].mxu0 }
 0x11e   : > { %v1186_v47 = vmax.f32 %v753_v55, 0.0  ;;  %v1190_v28 = vmax.f32 %v979_v27, 0.0 }
 0x11f   : > { %v1289_v50 = vpack.c.bf16 %v1185_v41, %v1177_v39  ;;  %v4166_v30 = vpack.c.bf16 %v1189_v44, %v1181_v20 }
 0x120   : > { %v1290_v52 = vpack.c.bf16 %v1186_v47, %v1178_v46  ;;  %v4168_v32 = vpack.c.bf16 %v1190_v28, %v1182_v24 }
 0x122   : > { %v757_v57 = vpop.f32.mrb[12].mxu1  ;;  %2169 = vmatprep.mubr.bf16.mxu1 %v1290_v52  ;;  %v983_v38 = vpop.f32.mrb[12].mxu0 }
 0x123   : > { %v759_v59 = vpop.f32.mrb[13].mxu1  ;;  %2170 = vmatmul.mubr.bf16.gmra.mrb[104].mxu1 %v1289_v50  ;;  %v1193_v61 = vmax.f32 %v757_v57, 0.0  ;;  %v1197_v55 = vmax.f32 %v983_v38, 0.0  ;;  %v985_v45 = vpop.f32.mrb[13].mxu0 }
 0x124   : > { %v761_v60 = vpop.f32.mrb[14].mxu1  ;;  %v1194_v1 = vmax.f32 %v759_v59, 0.0  ;;  %v1198_v47 = vmax.f32 %v985_v45, 0.0  ;;  %v987_v48 = vpop.f32.mrb[14].mxu0 }
 0x125   : > { %v1201_v62 = vmax.f32 %v761_v60, 0.0  ;;  %v763_v63 = vpop.f32.mrb[15].mxu1  ;;  %v1205_v50 = vmax.f32 %v987_v48, 0.0  ;;  %v989_v51 = vpop.f32.mrb[15].mxu0 }
 0x126   : > { %v1202_v2 = vmax.f32 %v763_v63, 0.0  ;;  %v1206_v8 = vmax.f32 %v989_v51, 0.0 }
 0x127   : > { %v1297_v4 = vpack.c.bf16 %v1201_v62, %v1193_v61  ;;  %v4170_v53 = vpack.c.bf16 %v1205_v50, %v1197_v55 }
 0x128   : > { %v1298_v40 = vpack.c.bf16 %v1202_v2, %v1194_v1  ;;  %v4172_v56 = vpack.c.bf16 %v1206_v8, %v1198_v47  ;;  %v3380_v8 = vld [vmem:[%s4643_s3 + $0x200] ss:$8 sps:$4 sm:$0xff]  }
 0x12a   : > { %v767_v42 = vpop.f32.mrb[16].mxu1  ;;  %2179 = vmatprep.mubr.bf16.mxu1 %v1298_v40  ;;  %v993_v62 = vpop.f32.mrb[16].mxu0 }
 0x12b   : > { %v769_v13 = vpop.f32.mrb[17].mxu1  ;;  %2180 = vmatmul.mubr.bf16.gmra.mrb[108].mxu1 %v1297_v4  ;;  %v1209_v6 = vmax.f32 %v767_v42, 0.0  ;;  %v1213_v1 = vmax.f32 %v993_v62, 0.0  ;;  %v995_v2 = vpop.f32.mrb[17].mxu0 }
 0x12c   : > { %v771_v43 = vpop.f32.mrb[18].mxu1  ;;  %v1210_v18 = vmax.f32 %v769_v13, 0.0  ;;  %v1214_v3 = vmax.f32 %v995_v2, 0.0  ;;  %v997_v4 = vpop.f32.mrb[18].mxu0 }
 0x12d   : > { %v1217_v15 = vmax.f32 %v771_v43, 0.0  ;;  %v773_v16 = vpop.f32.mrb[19].mxu1  ;;  %v1221_v7 = vmax.f32 %v997_v4, 0.0  ;;  %v999_v40 = vpop.f32.mrb[19].mxu0  ;;  %v3388_v4 = vld [vmem:[%s4643_s3 + $0x224] ss:$8 sps:$4 sm:$0xff]  }
 0x12e   : > { %v1218_v19 = vmax.f32 %v773_v16, 0.0  ;;  %v1222_v9 = vmax.f32 %v999_v40, 0.0 }
 0x12f   : > { %v1305_v22 = vpack.c.bf16 %v1217_v15, %v1209_v6  ;;  %v4174_v11 = vpack.c.bf16 %v1221_v7, %v1213_v1  ;;  %v3383_v1 = vld [vmem:[%s4643_s3 + $0x210] ss:$8 sps:$4 sm:$0xff]  }
 0x130   : > { %v1306_v26 = vpack.c.bf16 %v1218_v19, %v1210_v18  ;;  %v4176_v13 = vpack.c.bf16 %v1222_v9, %v1214_v3 }
 0x132   : > { %v777_v29 = vpop.f32.mrb[20].mxu1  ;;  %2189 = vmatprep.mubr.bf16.mxu1 %v1306_v26  ;;  %v1003_v17 = vpop.f32.mrb[20].mxu0 }
 0x133   : > { %v779_v31 = vpop.f32.mrb[21].mxu1  ;;  %2190 = vmatmul.mubr.bf16.gmra.mrb[112].mxu1 %v1305_v22  ;;  %v1225_v35 = vmax.f32 %v777_v29, 0.0  ;;  %v1229_v20 = vmax.f32 %v1003_v17, 0.0  ;;  %v1005_v21 = vpop.f32.mrb[21].mxu0 }
 0x134   : > { %v781_v34 = vpop.f32.mrb[22].mxu1  ;;  %v1226_v39 = vmax.f32 %v779_v31, 0.0  ;;  %v1230_v24 = vmax.f32 %v1005_v21, 0.0  ;;  %v1007_v25 = vpop.f32.mrb[22].mxu0 }
 0x135   : > { %v1233_v36 = vmax.f32 %v781_v34, 0.0  ;;  %v783_v37 = vpop.f32.mrb[23].mxu1  ;;  %v1237_v44 = vmax.f32 %v1007_v25, 0.0  ;;  %v1009_v27 = vpop.f32.mrb[23].mxu0 }
 0x136   : > { %v1234_v41 = vmax.f32 %v783_v37, 0.0  ;;  %v1238_v28 = vmax.f32 %v1009_v27, 0.0 }
 0x137   : > { %v1313_v46 = vpack.c.bf16 %v1233_v36, %v1225_v35  ;;  %v4178_v31 = vpack.c.bf16 %v1237_v44, %v1229_v20  ;;  %v3389_v44 = vld [vmem:[%s4643_s3 + $0x230] ss:$8 sps:$4 sm:$0xff]  }
 0x138   : > { %v1314_v49 = vpack.c.bf16 %v1234_v41, %v1226_v39  ;;  %v4180_v35 = vpack.c.bf16 %v1238_v28, %v1230_v24 }
 0x13a   : > { %v787_v52 = vpop.f32.mrb[24].mxu1  ;;  %2199 = vmatprep.mubr.bf16.mxu1 %v1314_v49  ;;  %v1013_v41 = vpop.f32.mrb[24].mxu0 }
 0x13b   : > { %v789_v54 = vpop.f32.mrb[25].mxu1  ;;  %2200 = vmatmul.mubr.bf16.gmra.mrb[116].mxu1 %v1313_v46  ;;  %v1241_v59 = vmax.f32 %v787_v52, 0.0  ;;  %v1245_v46 = vmax.f32 %v1013_v41, 0.0  ;;  %v1015_v47 = vpop.f32.mrb[25].mxu0  ;;  %v3392_v41 = vld [vmem:[%s4643_s3 + $0x240] ss:$8 sps:$4 sm:$0xff]  }
 0x13c   : > { %v791_v57 = vpop.f32.mrb[26].mxu1  ;;  %v1242_v63 = vmax.f32 %v789_v54, 0.0  ;;  %v1246_v49 = vmax.f32 %v1015_v47, 0.0  ;;  %v1017_v50 = vpop.f32.mrb[26].mxu0 }
 0x13d   : > { %v1249_v60 = vmax.f32 %v791_v57, 0.0  ;;  %v793_v61 = vpop.f32.mrb[27].mxu1  ;;  %v1253_v52 = vmax.f32 %v1017_v50, 0.0  ;;  %v1019_v54 = vpop.f32.mrb[27].mxu0  ;;  %v3385_v57 = vld [vmem:[%s4643_s3 + $0x214] ss:$8 sps:$4 sm:$0xff]  }
 0x13e   : > { %v1250_v0 = vmax.f32 %v793_v61, 0.0 }
 0x13f   : > { %v1321_v33 = vpack.c.bf16 %v1249_v60, %v1241_v59  ;;  %v1254_v59 = vmax.f32 %v1019_v54, 0.0  ;;  %v4188_v61 = vpack.c.bf16 %v1253_v52, %v1245_v46 }
 0x140   : > { %v1322_v5 = vpack.c.bf16 %v1250_v0, %v1242_v63 }
 0x141   : > { %v4190_v63 = vpack.c.bf16 %v1254_v59, %v1246_v49 }
 0x142   : > { %v797_v10 = vpop.f32.mrb[28].mxu1  ;;  %2209 = vmatprep.mubr.bf16.mxu1 %v1322_v5  ;;  %v1023_v5 = vpop.f32.mrb[28].mxu0 }
 0x143   : > { %v799_v42 = vpop.f32.mrb[29].mxu1  ;;  %2210 = vmatmul.mubr.bf16.gmra.mrb[120].mxu1 %v1321_v33  ;;  %v1257_v6 = vmax.f32 %v797_v10, 0.0  ;;  %v1261_v9 = vmax.f32 %v1023_v5, 0.0  ;;  %v1025_v10 = vpop.f32.mrb[29].mxu0 }
 0x144   : > { %v801_v43 = vpop.f32.mrb[30].mxu1  ;;  %v1258_v18 = vmax.f32 %v799_v42, 0.0 }
 0x145   : > { %v1265_v15 = vmax.f32 %v801_v43, 0.0  ;;  %v803_v16 = vpop.f32.mrb[31].mxu1  ;;  %v1262_v43 = vmax.f32 %v1025_v10, 0.0 }
 0x146   : > { %v1266_v19 = vmax.f32 %v803_v16, 0.0  ;;  %v3386_v16 = vld [vmem:[%s4643_s3 + $0x220] ss:$8 sps:$4 sm:$0xff]  }
 0x147   : > { %v1329_v22 = vpack.c.bf16 %v1265_v15, %v1257_v6  ;;  %v1027_v6 = vpop.f32.mrb[30].mxu0 }
 0x148   : > { %v1330_v26 = vpack.c.bf16 %v1266_v19, %v1258_v18  ;;  %v1269_v17 = vmax.f32 %v1027_v6, 0.0  ;;  %v1029_v18 = vpop.f32.mrb[31].mxu0  ;;  %v3391_v19 = vld [vmem:[%s4643_s3 + $0x234] ss:$8 sps:$4 sm:$0xff]  }
 0x149   : > { %v1270_v20 = vmax.f32 %v1029_v18, 0.0  ;;  %v3409_v6 = vld [vmem:[%s4643_s3 + $0x294] ss:$8 sps:$4 sm:$0xff]   ;;  %v3407_v18 = vld [vmem:[%s4643_s3 + $0x290] ss:$8 sps:$4 sm:$0xff]  }
 0x14a   : > { %v840_v29 = vpop.f32.mrb[32].mxu1  ;;  %2219 = vmatprep.mubr.bf16.mxu1 %v1330_v26 }
 0x14b   : > { %v842_v34 = vpop.f32.mrb[33].mxu1  ;;  %2220 = vmatmul.mubr.bf16.gmra.mrb[124].mxu1 %v1329_v22  ;;  %v1147_v37 = vmax.f32 %v840_v29, 0.0  ;;  %v4204_v22 = vpack.c.bf16 %v1269_v17, %v1261_v9  ;;  %v4206_v25 = vpack.c.bf16 %v1270_v20, %v1262_v43  ;;  %v3404_v43 = vld [vmem:[%s4643_s3 + $0x280] ss:$8 sps:$4 sm:$0xff]  }
 0x14c   : > { %v844_v36 = vpop.f32.mrb[34].mxu1  ;;  %v1148_v55 = vmax.f32 %v842_v34, 0.0  ;;  %v3394_v34 = vld [vmem:[%s4643_s3 + $0x244] ss:$8 sps:$4 sm:$0xff]  }
 0x14d   : > { %v1155_v38 = vmax.f32 %v844_v36, 0.0  ;;  %v846_v39 = vpop.f32.mrb[35].mxu1 }
 0x14e   : > { %v1156_v45 = vmax.f32 %v846_v39, 0.0 }
 0x14f   : > { %v1275_v48 = vpack.c.bf16 %v1155_v38, %v1147_v37 }
 0x150   : > { %v1276_v51 = vpack.c.bf16 %v1156_v45, %v1148_v55  ;;  %v3397_v55 = vld [vmem:[%s4643_s3 + $0x254] ss:$8 sps:$4 sm:$0xff]  }
 0x152   : > { %v850_v60 = vpop.f32.mrb[36].mxu1  ;;  %2262 = vmatprep.mubr.bf16.mxu0 %v1276_v51 }
 0x153   : > { %v852_v62 = vpop.f32.mrb[37].mxu1  ;;  %2263 = vmatmul.mubr.bf16.vlgmr.msra.gmra.mrb[32].mxu0 %v1275_v48  ;;  %v1163_v2 = vmax.f32 %v850_v60, 0.0  ;;  %v3395_v48 = vld [vmem:[%s4643_s3 + $0x250] ss:$8 sps:$4 sm:$0xff]   ;;  %v3398_v60 = vld [vmem:[%s4643_s3 + $0x260] ss:$8 sps:$4 sm:$0xff]  }
 0x154   : > { %v854_v0 = vpop.f32.mrb[38].mxu1  ;;  %2344 = vmatpush1.bf16.msra.mxu0 %v3380_v8  ;;  %v1164_v7 = vmax.f32 %v852_v62, 0.0  ;;  %v3400_v8 = vld [vmem:[%s4643_s3 + $0x264] ss:$8 sps:$4 sm:$0xff]   ;;  %v3403_v62 = vld [vmem:[%s4643_s3 + $0x274] ss:$8 sps:$4 sm:$0xff]  }
 0x155   : > { %v1171_v33 = vmax.f32 %v854_v0, 0.0  ;;  %v856_v3 = vpop.f32.mrb[39].mxu1  ;;  %2345 = vmatprep.subr.bf16.mxu0 %v3385_v57 }
 0x156   : > { %v1172_v40 = vmax.f32 %v856_v3, 0.0 }
 0x157   : > { %v1283_v42 = vpack.c.bf16 %v1171_v33, %v1163_v2  ;;  %v3401_v33 = vld [vmem:[%s4643_s3 + $0x270] ss:$8 sps:$4 sm:$0xff]  }
 0x158   : > { %v1284_v15 = vpack.c.bf16 %v1172_v40, %v1164_v7  ;;  %2346 = vmatpush1.bf16.msra.mxu0 %v3383_v1  ;;  %v3406_v7 = vld [vmem:[%s4643_s3 + $0x284] ss:$8 sps:$4 sm:$0xff]  }
 0x159   : > { %2347 = vmatprep.subr.bf16.mxu0 %v3388_v4 }
 0x15a   : > { %v860_v21 = vpop.f32.mrb[40].mxu1  ;;  %2272 = vmatprep.mubr.bf16.mxu0 %v1284_v15 }
 0x15b   : > { %v862_v24 = vpop.f32.mrb[41].mxu1  ;;  %2273 = vmatmul.mubr.bf16.gmra.mrb[36].mxu0 %v1283_v42  ;;  %v1179_v27 = vmax.f32 %v860_v21, 0.0 }
 0x15c   : > { %v864_v26 = vpop.f32.mrb[42].mxu1  ;;  %2348 = vmatpush1.bf16.msra.mxu0 %v3386_v16  ;;  %v1180_v36 = vmax.f32 %v862_v24, 0.0  ;;  %v3412_v24 = vld [vmem:[%s4643_s3 + $0x2a4] ss:$8 sps:$4 sm:$0xff]  }
 0x15d   : > { %v1187_v28 = vmax.f32 %v864_v26, 0.0  ;;  %v866_v29 = vpop.f32.mrb[43].mxu1  ;;  %2349 = vmatprep.subr.bf16.mxu0 %v3391_v19 }
 0x15e   : > { %v1188_v37 = vmax.f32 %v866_v29, 0.0  ;;  %v3410_v29 = vld [vmem:[%s4643_s3 + $0x2a0] ss:$8 sps:$4 sm:$0xff]  }
 0x15f   : > { %v1291_v38 = vpack.c.bf16 %v1187_v28, %v1179_v27 }
 0x160   : > { %v1292_v39 = vpack.c.bf16 %v1188_v37, %v1180_v36  ;;  %2350 = vmatpush1.bf16.msra.mxu0 %v3389_v44 }
 0x161   : > { %2351 = vmatprep.subr.bf16.mxu0 %v3394_v34  ;;  %v3415_v34 = vld [vmem:[%s4643_s3 + $0x2b4] ss:$8 sps:$4 sm:$0xff]  }
 0x162   : > { %v870_v45 = vpop.f32.mrb[44].mxu1  ;;  %2282 = vmatprep.mubr.bf16.mxu0 %v1292_v39  ;;  %v3413_v39 = vld [vmem:[%s4643_s3 + $0x2b0] ss:$8 sps:$4 sm:$0xff]  }
 0x163   : > { %v872_v46 = vpop.f32.mrb[45].mxu1  ;;  %2283 = vmatmul.mubr.bf16.gmra.mrb[40].mxu0 %v1291_v38  ;;  %v1195_v49 = vmax.f32 %v870_v45, 0.0 }
 0x164   : > { %v874_v47 = vpop.f32.mrb[46].mxu1  ;;  %2352 = vmatpush1.bf16.msra.mxu0 %v3392_v41  ;;  %v1196_v52 = vmax.f32 %v872_v46, 0.0  ;;  %v3418_v46 = vld [vmem:[%s4643_s3 + $0x2c4] ss:$8 sps:$4 sm:$0xff]  }
 0x165   : > { %v1203_v50 = vmax.f32 %v874_v47, 0.0  ;;  %v876_v51 = vpop.f32.mrb[47].mxu1  ;;  %2353 = vmatprep.subr.bf16.mxu0 %v3397_v55 }
 0x166   : > { %v1204_v54 = vmax.f32 %v876_v51, 0.0  ;;  %v3416_v51 = vld [vmem:[%s4643_s3 + $0x2c0] ss:$8 sps:$4 sm:$0xff]  }
 0x167   : > { %v1299_v57 = vpack.c.bf16 %v1203_v50, %v1195_v49 }
 0x168   : > { %v1300_v59 = vpack.c.bf16 %v1204_v54, %v1196_v52  ;;  %2354 = vmatpush1.bf16.msra.mxu0 %v3395_v48 }
 0x169   : > { %2355 = vmatprep.subr.bf16.mxu0 %v3400_v8  ;;  %v3421_v8 = vld [vmem:[%s4643_s3 + $0x2d4] ss:$8 sps:$4 sm:$0xff]  }
 0x16a   : > { %v880_v0 = vpop.f32.mrb[48].mxu1  ;;  %2292 = vmatprep.mubr.bf16.mxu0 %v1300_v59  ;;  %v3419_v59 = vld [vmem:[%s4643_s3 + $0x2d0] ss:$8 sps:$4 sm:$0xff]  }
 0x16b   : > { %v882_v1 = vpop.f32.mrb[49].mxu1  ;;  %2293 = vmatmul.mubr.bf16.gmra.mrb[44].mxu0 %v1299_v57  ;;  %v1211_v3 = vmax.f32 %v880_v0, 0.0 }
 0x16c   : > { %v884_v2 = vpop.f32.mrb[50].mxu1  ;;  %2356 = vmatpush1.bf16.msra.mxu0 %v3398_v60  ;;  %v1212_v40 = vmax.f32 %v882_v1, 0.0  ;;  %v3424_v1 = vld [vmem:[%s4643_s3 + $0x2e4] ss:$8 sps:$4 sm:$0xff]  }
 0x16d   : > { %v1219_v4 = vmax.f32 %v884_v2, 0.0  ;;  %v886_v5 = vpop.f32.mrb[51].mxu1  ;;  %2357 = vmatprep.subr.bf16.mxu0 %v3403_v62 }
 0x16e   : > { %v1220_v9 = vmax.f32 %v886_v5, 0.0  ;;  %v3422_v5 = vld [vmem:[%s4643_s3 + $0x2e0] ss:$8 sps:$4 sm:$0xff]  }
 0x16f   : > { %v1307_v10 = vpack.c.bf16 %v1219_v4, %v1211_v3 }
 0x170   : > { %v1308_v42 = vpack.c.bf16 %v1220_v9, %v1212_v40  ;;  %2358 = vmatpush1.bf16.msra.mxu0 %v3401_v33 }
 0x171   : > { %2359 = vmatprep.subr.bf16.mxu0 %v3406_v7  ;;  %v3427_v7 = vld [vmem:[%s4643_s3 + $0x2f4] ss:$8 sps:$4 sm:$0xff]  }
 0x172   : > { %v890_v15 = vpop.f32.mrb[52].mxu1  ;;  %2302 = vmatprep.mubr.bf16.mxu0 %v1308_v42  ;;  %v3425_v42 = vld [vmem:[%s4643_s3 + $0x2f0] ss:$8 sps:$4 sm:$0xff]  }
 0x173   : > { %v892_v16 = vpop.f32.mrb[53].mxu1  ;;  %2303 = vmatmul.mubr.bf16.gmra.mrb[48].mxu0 %v1307_v10  ;;  %v1227_v19 = vmax.f32 %v890_v15, 0.0  ;;  %v3430_v15 = vld [vmem:[%s4643_s3 + $0x304] ss:$8 sps:$4 sm:$0xff]  }
 0x174   : > { %v894_v17 = vpop.f32.mrb[54].mxu1  ;;  %2360 = vmatpush1.bf16.msra.mxu0 %v3404_v43  ;;  %v1228_v26 = vmax.f32 %v892_v16, 0.0 }
 0x175   : > { %v1235_v20 = vmax.f32 %v894_v17, 0.0  ;;  %v896_v21 = vpop.f32.mrb[55].mxu1  ;;  %2361 = vmatprep.subr.bf16.mxu0 %v3409_v6 }
 0x176   : > { %v1236_v44 = vmax.f32 %v896_v21, 0.0 }
 0x177   : > { %v1315_v27 = vpack.c.bf16 %v1235_v20, %v1227_v19  ;;  %v3428_v20 = vld [vmem:[%s4643_s3 + $0x300] ss:$8 sps:$4 sm:$0xff]  }
 0x178   : > { %v1316_v28 = vpack.c.bf16 %v1236_v44, %v1228_v26  ;;  %2362 = vmatpush1.bf16.msra.mxu0 %v3407_v18 }
 0x179   : > { %2363 = vmatprep.subr.bf16.mxu0 %v3412_v24 }
 0x17a   : > { %v900_v36 = vpop.f32.mrb[56].mxu1  ;;  %2312 = vmatprep.mubr.bf16.mxu0 %v1316_v28 }
 0x17b   : > { %v902_v37 = vpop.f32.mrb[57].mxu1  ;;  %2313 = vmatmul.mubr.bf16.gmra.mrb[52].mxu0 %v1315_v27  ;;  %v1243_v41 = vmax.f32 %v900_v36, 0.0  ;;  %v3431_v27 = vld [vmem:[%s4643_s3 + $0x310] ss:$8 sps:$4 sm:$0xff]  }
 0x17c   : > { %v904_v38 = vpop.f32.mrb[58].mxu1  ;;  %2364 = vmatpush1.bf16.msra.mxu0 %v3410_v29  ;;  %v1244_v47 = vmax.f32 %v902_v37, 0.0 }
 0x17d   : > { %v1251_v55 = vmax.f32 %v904_v38, 0.0  ;;  %v906_v45 = vpop.f32.mrb[59].mxu1  ;;  %2365 = vmatprep.subr.bf16.mxu0 %v3415_v34  ;;  %v3436_v34 = vld [vmem:[%s4643_s3 + $0x324] ss:$8 sps:$4 sm:$0xff]  }
 0x17e   : > { %v1252_v48 = vmax.f32 %v906_v45, 0.0 }
 0x17f   : > { %v1323_v49 = vpack.c.bf16 %v1251_v55, %v1243_v41 }
 0x180   : > { %v1324_v50 = vpack.c.bf16 %v1252_v48, %v1244_v47  ;;  %2366 = vmatpush1.bf16.msra.mxu0 %v3413_v39  ;;  %v3434_v39 = vld [vmem:[%s4643_s3 + $0x320] ss:$8 sps:$4 sm:$0xff]   ;;  %v3437_v47 = vld [vmem:[%s4643_s3 + $0x330] ss:$8 sps:$4 sm:$0xff]  }
 0x181   : > { %2367 = vmatprep.subr.bf16.mxu0 %v3418_v46 }
 0x182   : > { %v910_v52 = vpop.f32.mrb[60].mxu1  ;;  %2322 = vmatprep.mubr.bf16.mxu0 %v1324_v50  ;;  %v3442_v50 = vld [vmem:[%s4643_s3 + $0x344] ss:$8 sps:$4 sm:$0xff]  }
 0x183   : > { %v912_v54 = vpop.f32.mrb[61].mxu1  ;;  %2323 = vmatmul.mubr.bf16.gmra.mrb[56].mxu0 %v1323_v49  ;;  %v1259_v60 = vmax.f32 %v910_v52, 0.0 }
 0x184   : > { %v914_v57 = vpop.f32.mrb[62].mxu1  ;;  %2368 = vmatpush1.bf16.msra.mxu0 %v3416_v51  ;;  %v1260_v2 = vmax.f32 %v912_v54, 0.0  ;;  %v3440_v54 = vld [vmem:[%s4643_s3 + $0x340] ss:$8 sps:$4 sm:$0xff]  }
 0x185   : > { %v1267_v62 = vmax.f32 %v914_v57, 0.0  ;;  %v916_v0 = vpop.f32.mrb[63].mxu1  ;;  %2369 = vmatprep.subr.bf16.mxu0 %v3421_v8 }
 0x186   : > { %v1268_v33 = vmax.f32 %v916_v0, 0.0  ;;  %v3443_v0 = vld [vmem:[%s4643_s3 + $0x350] ss:$8 sps:$4 sm:$0xff]  }
 0x187   : > { %v1331_v3 = vpack.c.bf16 %v1267_v62, %v1259_v60 }
 0x188   : > { %v1332_v4 = vpack.c.bf16 %v1268_v33, %v1260_v2  ;;  %2370 = vmatpush1.bf16.msra.mxu0 %v3419_v59  ;;  %v3448_v33 = vld [vmem:[%s4643_s3 + $0x364] ss:$8 sps:$4 sm:$0xff]  }
 0x189   : > { %2371 = vmatprep.subr.bf16.mxu0 %v3424_v1 }
 0x18a   : > { %2332 = vmatprep.mubr.bf16.mxu0 %v1332_v4  ;;  %v1066_v40 = vpop.f32.mrb[64].mxu1 }
 0x18b   : > { %2333 = vmatmul.mubr.bf16.gmra.mrb[60].mxu0 %v1331_v3  ;;  %v1151_v9 = vmax.f32 %v1066_v40, 0.0  ;;  %v1068_v10 = vpop.f32.mrb[65].mxu1 }
 0x18c   : > { %2372 = vmatpush1.bf16.msra.mxu0 %v3422_v5  ;;  %2375 = vmatprep.mubr.bf16.mxu0 %v4160_v23  ;;  %v1152_v43 = vmax.f32 %v1068_v10, 0.0  ;;  %v1070_v6 = vpop.f32.mrb[66].mxu1  ;;  %v3433_v23 = vld [vmem:[%s4643_s3 + $0x314] ss:$8 sps:$4 sm:$0xff]  }
 0x18d   : > { %2373 = vmatprep.subr.bf16.mxu0 %v3427_v7  ;;  %v1159_v16 = vmax.f32 %v1070_v6, 0.0  ;;  %v1072_v17 = vpop.f32.mrb[67].mxu1  ;;  %v3446_v7 = vld [vmem:[%s4643_s3 + $0x360] ss:$8 sps:$4 sm:$0xff]  }
 0x18e   : > { %v1160_v18 = vmax.f32 %v1072_v17, 0.0 }
 0x18f   : > { %v4287_v19 = vpack.c.bf16 %v1159_v16, %v1151_v9  ;;  %v3454_v16 = vld [vmem:[%s4643_s3 + $0x384] ss:$8 sps:$4 sm:$0xff]  }
 0x190   : > { %2374 = vmatpush1.bf16.msra.mxu0 %v3425_v42  ;;  %v4292_v21 = vpack.c.bf16 %v1160_v18, %v1152_v43  ;;  %v3449_v43 = vld [vmem:[%s4643_s3 + $0x370] ss:$8 sps:$4 sm:$0xff]  }
 0x191   : > { %2456 = vmatprep.subr.bf16.mxu0 %v3430_v15 }
 0x192   : > { %v1076_v24 = vpop.f32.mrb[68].mxu1 }
 0x193   : > { %2376 = vmatmul.mubr.bf16.vlgmr.msra.gmra.mrb[32].mxu0 %v4158_v58  ;;  %v1167_v26 = vmax.f32 %v1076_v24, 0.0  ;;  %v1078_v44 = vpop.f32.mrb[69].mxu1 }
 0x194   : > { %2457 = vmatpush1.bf16.msra.mxu0 %v3428_v20  ;;  %2385 = vmatprep.mubr.bf16.mxu0 %v4164_v14  ;;  %v1168_v28 = vmax.f32 %v1078_v44, 0.0  ;;  %v1080_v29 = vpop.f32.mrb[70].mxu1  ;;  %v3439_v14 = vld [vmem:[%s4643_s3 + $0x334] ss:$8 sps:$4 sm:$0xff]  }
 0x195   : > { %2458 = vmatprep.subr.bf16.mxu0 %v3433_v23  ;;  %v1175_v36 = vmax.f32 %v1080_v29, 0.0  ;;  %v1082_v37 = vpop.f32.mrb[71].mxu1  ;;  %v3452_v23 = vld [vmem:[%s4643_s3 + $0x380] ss:$8 sps:$4 sm:$0xff]  }
 0x196   : > { %v1176_v38 = vmax.f32 %v1082_v37, 0.0 }
 0x197   : > { %v4305_v58 = vpack.c.bf16 %v1175_v36, %v1167_v26  ;;  %v3460_v36 = vld [vmem:[%s4643_s3 + $0x3a4] ss:$8 sps:$4 sm:$0xff]  }
 0x198   : > { %2459 = vmatpush1.bf16.msra.mxu0 %v3431_v27  ;;  %v4310_v41 = vpack.c.bf16 %v1176_v38, %v1168_v28  ;;  %v3455_v28 = vld [vmem:[%s4643_s3 + $0x390] ss:$8 sps:$4 sm:$0xff]  }
 0x199   : > { %2460 = vmatprep.subr.bf16.mxu0 %v3436_v34 }
 0x19a   : > { %v1086_v55 = vpop.f32.mrb[72].mxu1 }
 0x19b   : > { %2386 = vmatmul.mubr.bf16.gmra.mrb[36].mxu0 %v4162_v12  ;;  %v1183_v45 = vmax.f32 %v1086_v55, 0.0  ;;  %v1088_v46 = vpop.f32.mrb[73].mxu1 }
 0x19c   : > { %2461 = vmatpush1.bf16.msra.mxu0 %v3434_v39  ;;  %2395 = vmatprep.mubr.bf16.mxu0 %v4168_v32  ;;  %v1184_v48 = vmax.f32 %v1088_v46, 0.0  ;;  %v1090_v49 = vpop.f32.mrb[74].mxu1  ;;  %v3445_v32 = vld [vmem:[%s4643_s3 + $0x354] ss:$8 sps:$4 sm:$0xff]  }
 0x19d   : > { %2462 = vmatprep.subr.bf16.mxu0 %v3439_v14  ;;  %v1191_v51 = vmax.f32 %v1090_v49, 0.0  ;;  %v1092_v8 = vpop.f32.mrb[75].mxu1  ;;  %v3458_v14 = vld [vmem:[%s4643_s3 + $0x3a0] ss:$8 sps:$4 sm:$0xff]  }
 0x19e   : > { %v1192_v52 = vmax.f32 %v1092_v8, 0.0 }
 0x19f   : > { %v4323_v12 = vpack.c.bf16 %v1191_v51, %v1183_v45  ;;  %v3466_v51 = vld [vmem:[%s4643_s3 + $0x3c4] ss:$8 sps:$4 sm:$0xff]  }
 0x1a0   : > { %2463 = vmatpush1.bf16.msra.mxu0 %v3437_v47  ;;  %v4328_v57 = vpack.c.bf16 %v1192_v52, %v1184_v48  ;;  %v3461_v48 = vld [vmem:[%s4643_s3 + $0x3b0] ss:$8 sps:$4 sm:$0xff]  }
 0x1a1   : > { %2464 = vmatprep.subr.bf16.mxu0 %v3442_v50 }
 0x1a2   : > { %v1096_v59 = vpop.f32.mrb[76].mxu1 }
 0x1a3   : > { %2396 = vmatmul.mubr.bf16.gmra.mrb[40].mxu0 %v4166_v30  ;;  %v1199_v60 = vmax.f32 %v1096_v59, 0.0  ;;  %v1098_v62 = vpop.f32.mrb[77].mxu1 }
 0x1a4   : > { %2465 = vmatpush1.bf16.msra.mxu0 %v3440_v54  ;;  %2405 = vmatprep.mubr.bf16.mxu0 %v4172_v56  ;;  %v1200_v1 = vmax.f32 %v1098_v62, 0.0  ;;  %v1100_v2 = vpop.f32.mrb[78].mxu1  ;;  %v3451_v56 = vld [vmem:[%s4643_s3 + $0x374] ss:$8 sps:$4 sm:$0xff]  }
 0x1a5   : > { %2466 = vmatprep.subr.bf16.mxu0 %v3445_v32  ;;  %v1207_v3 = vmax.f32 %v1100_v2, 0.0  ;;  %v1102_v4 = vpop.f32.mrb[79].mxu1  ;;  %v3464_v32 = vld [vmem:[%s4643_s3 + $0x3c0] ss:$8 sps:$4 sm:$0xff]  }
 0x1a6   : > { %v1208_v5 = vmax.f32 %v1102_v4, 0.0 }
 0x1a7   : > { %v4341_v30 = vpack.c.bf16 %v1207_v3, %v1199_v60  ;;  %v3472_v3 = vld [vmem:[%s4643_s3 + $0x3e4] ss:$8 sps:$4 sm:$0xff]  }
 0x1a8   : > { %2467 = vmatpush1.bf16.msra.mxu0 %v3443_v0  ;;  %v4346_v40 = vpack.c.bf16 %v1208_v5, %v1200_v1  ;;  %v3467_v1 = vld [vmem:[%s4643_s3 + $0x3d0] ss:$8 sps:$4 sm:$0xff]  }
 0x1a9   : > { %2468 = vmatprep.subr.bf16.mxu0 %v3448_v33 }
 0x1aa   : > { %v1106_v9 = vpop.f32.mrb[80].mxu1 }
 0x1ab   : > { %2406 = vmatmul.mubr.bf16.gmra.mrb[44].mxu0 %v4170_v53  ;;  %v1215_v10 = vmax.f32 %v1106_v9, 0.0  ;;  %v1108_v42 = vpop.f32.mrb[81].mxu1 }
 0x1ac   : > { %2469 = vmatpush1.bf16.msra.mxu0 %v3446_v7  ;;  %2415 = vmatprep.mubr.bf16.mxu0 %v4176_v13  ;;  %v1216_v6 = vmax.f32 %v1108_v42, 0.0  ;;  %v1110_v15 = vpop.f32.mrb[82].mxu1  ;;  %v3457_v13 = vld [vmem:[%s4643_s3 + $0x394] ss:$8 sps:$4 sm:$0xff]  }
 0x1ad   : > { %2470 = vmatprep.subr.bf16.mxu0 %v3451_v56  ;;  %v1223_v17 = vmax.f32 %v1110_v15, 0.0  ;;  %v1112_v18 = vpop.f32.mrb[83].mxu1  ;;  %v3470_v56 = vld [vmem:[%s4643_s3 + $0x3e0] ss:$8 sps:$4 sm:$0xff]  }
 0x1ae   : > { %v1224_v20 = vmax.f32 %v1112_v18, 0.0 }
 0x1af   : > { %v4359_v53 = vpack.c.bf16 %v1223_v17, %v1215_v10  ;;  %v3473_v10 = vld [vmem:[%s4643_s3 + $0x3f0] ss:$8 sps:$4 sm:$0xff]  }
 0x1b0   : > { %2471 = vmatpush1.bf16.msra.mxu0 %v3449_v43  ;;  %v4364_v24 = vpack.c.bf16 %v1224_v20, %v1216_v6 }
 0x1b1   : > { %2472 = vmatprep.subr.bf16.mxu0 %v3454_v16 }
 0x1b2   : > { %v1116_v26 = vpop.f32.mrb[84].mxu1 }
 0x1b3   : > { %2416 = vmatmul.mubr.bf16.gmra.mrb[48].mxu0 %v4174_v11  ;;  %v1231_v44 = vmax.f32 %v1116_v26, 0.0  ;;  %v1118_v27 = vpop.f32.mrb[85].mxu1 }
 0x1b4   : > { %2473 = vmatpush1.bf16.msra.mxu0 %v3452_v23  ;;  %2425 = vmatprep.mubr.bf16.mxu0 %v4180_v35  ;;  %v1232_v29 = vmax.f32 %v1118_v27, 0.0  ;;  %v1120_v34 = vpop.f32.mrb[86].mxu1  ;;  %v3463_v35 = vld [vmem:[%s4643_s3 + $0x3b4] ss:$8 sps:$4 sm:$0xff]  }
 0x1b5   : > { %2474 = vmatprep.subr.bf16.mxu0 %v3457_v13  ;;  %v1239_v37 = vmax.f32 %v1120_v34, 0.0  ;;  %v1122_v38 = vpop.f32.mrb[87].mxu1 }
 0x1b6   : > { %v1240_v39 = vmax.f32 %v1122_v38, 0.0 }
 0x1b7   : > { %v4377_v11 = vpack.c.bf16 %v1239_v37, %v1231_v44 }
 0x1b8   : > { %2475 = vmatpush1.bf16.msra.mxu0 %v3455_v28  ;;  %v4382_v55 = vpack.c.bf16 %v1240_v39, %v1232_v29 }
 0x1b9   : > { %2476 = vmatprep.subr.bf16.mxu0 %v3460_v36 }
 0x1ba   : > { %v1126_v45 = vpop.f32.mrb[88].mxu1 }
 0x1bb   : > { %2426 = vmatmul.mubr.bf16.gmra.mrb[52].mxu0 %v4178_v31  ;;  %v1247_v46 = vmax.f32 %v1126_v45, 0.0  ;;  %v1128_v47 = vpop.f32.mrb[89].mxu1  ;;  %v1465_v45 = vld [vmem:[%s242_s9] sm:$0x3]  ;;  %s3482_s9 = scalar_lea.vmem %s3481_s14, 4096 }
 0x1bc   : > { %2477 = vmatpush1.bf16.msra.mxu0 %v3458_v14  ;;  %2435 = vmatprep.mubr.bf16.mxu0 %v4190_v63  ;;  %v1248_v49 = vmax.f32 %v1128_v47, 0.0  ;;  %v1130_v50 = vpop.f32.mrb[90].mxu1  ;;  %v3469_v63 = vld [vmem:[%s4643_s3 + $0x3d4] ss:$8 sps:$4 sm:$0xff]   ;;  %v1467_v14 = vlaneseq  ;;  %p3484_p5 = scmp.lt.s32.totalorder %s3482_s9, %s3476_s30 }
 0x1bd   : > { %2478 = vmatprep.subr.bf16.mxu0 %v3463_v35  ;;  %v1255_v8 = vmax.f32 %v1130_v50, 0.0  ;;  %v1132_v52 = vpop.f32.mrb[91].mxu1 }
 0x1be   : > { %v1256_v54 = vmax.f32 %v1132_v52, 0.0  ;;  %p3485_p6 = por %p3484_p5, %p3483_p4 }
 0x1bf   : > { %v1327_v31 = vpack.c.bf16 %v1255_v8, %v1247_v46 }
 0x1c0   : > { %2479 = vmatpush1.bf16.msra.mxu0 %v3461_v48  ;;  %v1328_v59 = vpack.c.bf16 %v1256_v54, %v1248_v49  ;;  %p3486_p7 = pnand %p3485_p6, %p3479_p2 }
 0x1c1   : > { %2480 = vmatprep.subr.bf16.mxu0 %v3466_v51 }
 0x1c2   : > { %v1136_v60 = vpop.f32.mrb[92].mxu1 }
 0x1c3   : > { %2436 = vmatmul.mubr.bf16.gmra.mrb[56].mxu0 %v4188_v61  ;;  %v1263_v62 = vmax.f32 %v1136_v60, 0.0  ;;  %v1138_v0 = vpop.f32.mrb[93].mxu1 }
 0x1c4   : > { %2481 = vmatpush1.bf16.msra.mxu0 %v3464_v32  ;;  %2445 = vmatprep.mubr.bf16.mxu0 %v4206_v25  ;;  %v1264_v2 = vmax.f32 %v1138_v0, 0.0  ;;  %v1140_v33 = vpop.f32.mrb[94].mxu1  ;;  %v3475_v25 = vld [vmem:[%s4643_s3 + $0x3f4] ss:$8 sps:$4 sm:$0xff]  }
 0x1c5   : > { %2482 = vmatprep.subr.bf16.mxu0 %v3469_v63  ;;  %v1271_v4 = vmax.f32 %v1140_v33, 0.0  ;;  %v1142_v5 = vpop.f32.mrb[95].mxu1 }
 0x1c6   : > { %v1272_v7 = vmax.f32 %v1142_v5, 0.0 }
 0x1c7   : > { %v1335_v61 = vpack.c.bf16 %v1271_v4, %v1263_v62 }
 0x1c8   : > { %2483 = vmatpush1.bf16.msra.mxu0 %v3467_v1  ;;  %v1336_v9 = vpack.c.bf16 %v1272_v7, %v1264_v2 }
 0x1c9   : > { %2484 = vmatprep.subr.bf16.mxu0 %v3472_v3 }
 0x1cb   : > { %2446 = vmatmul.mubr.bf16.gmra.mrb[60].mxu0 %v4204_v22 }
 0x1cc   : > { %2485 = vmatpush1.bf16.msra.mxu0 %v3470_v56  ;;  %2488 = vmatprep.mubr.bf16.mxu0 %v4292_v21 }
 0x1cd   : > { %2486 = vmatprep.subr.bf16.mxu0 %v3475_v25 }
 0x1d0   : > { %2487 = vmatpush1.bf16.msra.mxu0 %v3473_v10 }
 0x1d3   : > { %2489 = vmatmul.mubr.bf16.vlgmr.msra.gmra.mrb[32].mxu0 %v4287_v19 }
 0x1d4   : > { %2498 = vmatprep.mubr.bf16.mxu0 %v4310_v41 }
 0x1db   : > { %2499 = vmatmul.mubr.bf16.gmra.mrb[36].mxu0 %v4305_v58 }
 0x1dc   : > { %2508 = vmatprep.mubr.bf16.mxu0 %v4328_v57 }
 0x1e3   : > { %2509 = vmatmul.mubr.bf16.gmra.mrb[40].mxu0 %v4323_v12 }
 0x1e4   : > { %2518 = vmatprep.mubr.bf16.mxu0 %v4346_v40 }
 0x1e6   : > { %v2151_v22 = vpop.f32.mrb[96].mxu1 }
 0x1e7   : > { %v2153_v42 = vpop.f32.mrb[97].mxu1 }
 0x1e8   : > { %v2155_v43 = vpop.f32.mrb[98].mxu1 }
 0x1e9   : > { %v2157_v6 = vpop.f32.mrb[99].mxu1 }
 0x1eb   : > { %2519 = vmatmul.mubr.bf16.gmra.mrb[44].mxu0 %v4341_v30 }
 0x1ec   : > { %2528 = vmatprep.mubr.bf16.mxu0 %v4364_v24 }
 0x1ee   : > { %v4428_v21 = vpop.f32.mrb[100].mxu1 }
 0x1ef   : > { %v4430_v19 = vpop.f32.mrb[101].mxu1 }
 0x1f0   : > { %v4432_v41 = vpop.f32.mrb[102].mxu1 }
 0x1f1   : > { %v4434_v58 = vpop.f32.mrb[103].mxu1 }
 0x1f3   : > { %2529 = vmatmul.mubr.bf16.gmra.mrb[48].mxu0 %v4359_v53 }
 0x1f4   : > { %2538 = vmatprep.mubr.bf16.mxu0 %v4382_v55  ;;  %v1468_v55 = vshrl.u32 %v1467_v14, 7 }
 0x1f6   : > { %v4438_v12 = vpop.f32.mrb[104].mxu1  ;;  %v1469_v35 = vsub.s32 0, %v1468_v55  ;;  %v1473_v46 = vsub.s32 1, %v1468_v55 }
 0x1f7   : > { %v4440_v57 = vpop.f32.mrb[105].mxu1 }
 0x1f8   : > { %v4442_v40 = vpop.f32.mrb[106].mxu1  ;;  %v4491_v47 = vrot.slane %v1465_v45, %v1469_v35  ;;  %v4493_v48 = vrot.slane %v1465_v45, %v1473_v46 }
 0x1f9   : > { %v4444_v30 = vpop.f32.mrb[107].mxu1 }
 0x1fa   : > { %v2152_v49 = vadd.f32 %v2151_v22, %v4491_v47  ;;  %v2154_v50 = vadd.f32 %v2153_v42, %v4493_v48  ;;  %v2156_v8 = vadd.f32 %v2155_v43, %v4491_v47  ;;  %v2162_v4 = vadd.f32 %v4428_v21, %v4491_v47 }
 0x1fb   : > { %2539 = vmatmul.mubr.bf16.gmra.mrb[52].mxu0 %v4377_v11  ;;  %v2164_v5 = vadd.f32 %v4430_v19, %v4493_v48  ;;  %v2166_v56 = vadd.f32 %v4432_v41, %v4491_v47  ;;  %v2168_v10 = vadd.f32 %v4434_v58, %v4493_v48  ;;  %v2172_v41 = vadd.f32 %v4438_v12, %v4491_v47 }
 0x1fc   : > { %2548 = vmatprep.mubr.bf16.mxu0 %v1328_v59  ;;  %v2174_v46 = vadd.f32 %v4440_v57, %v4493_v48 }
 0x1fe   : > { %v4447_v15 = vpop.f32.mrb[108].mxu1 }
 0x1ff   : > { %v4449_v16 = vpop.f32.mrb[109].mxu1 }
 0x200   : > { %v4451_v17 = vpop.f32.mrb[110].mxu1 }
 0x201   : > { %v4453_v18 = vpop.f32.mrb[111].mxu1 }
 0x203   : > { %2549 = vmatmul.mubr.bf16.gmra.mrb[56].mxu0 %v1327_v31  ;;  %v2158_v31 = vadd.f32 %v2157_v6, %v4493_v48 }
 0x204   : > { %2558 = vmatprep.mubr.bf16.mxu0 %v1336_v9 }
 0x206   : > { %v4455_v20 = vpop.f32.mrb[112].mxu1 }
 0x207   : > { %v4457_v53 = vpop.f32.mrb[113].mxu1 }
 0x208   : > { %v4459_v23 = vpop.f32.mrb[114].mxu1 }
 0x209   : > { %v4461_v24 = vpop.f32.mrb[115].mxu1 }
 0x20b   : > { %2559 = vmatmul.mubr.bf16.gmra.mrb[60].mxu0 %v1335_v61 }
 0x20e   : > { %v4463_v13 = vpop.f32.mrb[116].mxu1 }
 0x20f   : > { %v4465_v26 = vpop.f32.mrb[117].mxu1 }
 0x210   : > { %v4467_v44 = vpop.f32.mrb[118].mxu1 }
 0x211   : > { %v4469_v27 = vpop.f32.mrb[119].mxu1 }
 0x216   : > { %v4471_v28 = vpop.f32.mrb[120].mxu1 }
 0x217   : > { %v4473_v29 = vpop.f32.mrb[121].mxu1 }
 0x218   : > { %v4475_v34 = vpop.f32.mrb[122].mxu1 }
 0x219   : > { %v4477_v36 = vpop.f32.mrb[123].mxu1 }
 0x21e   : > { %v4479_v37 = vpop.f32.mrb[124].mxu1 }
 0x21f   : > { %v4481_v38 = vpop.f32.mrb[125].mxu1 }
 0x220   : > { %v4483_v39 = vpop.f32.mrb[126].mxu1 }
 0x221   : > { %v4485_v11 = vpop.f32.mrb[127].mxu1 }
 0x2a6   : > { %v2490_v51 = vpop.f32.mrb[32].mxu0 }
 0x2a7   : > { %v3075_v52 = vadd.f32 %v2490_v51, %v2152_v49  ;;  %v2492_v54 = vpop.f32.mrb[33].mxu0 }
 0x2a8   : > { %v3077_v32 = vadd.f32 %v2492_v54, %v2154_v50  ;;  %v2494_v59 = vpop.f32.mrb[34].mxu0  ;;  %v2176_v50 = vadd.f32 %v4442_v40, %v4491_v47  ;;  %v2182_v40 = vadd.f32 %v4447_v15, %v4491_v47 }
 0x2a9   : > { %v2569_v63 = vmax.f32 %v3075_v52, 0.0  ;;  %v3079_v60 = vadd.f32 %v2494_v59, %v2156_v8  ;;  %v2496_v62 = vpop.f32.mrb[35].mxu0  ;;  %v2178_v52 = vadd.f32 %v4444_v30, %v4493_v48 }
 0x2aa   : > { %v2570_v0 = vmax.f32 %v3077_v32, 0.0  ;;  %v3081_v1 = vadd.f32 %v2496_v62, %v2158_v31 }
 0x2ab   : > { %v2571_v2 = vmax.f32 %v3079_v60, 0.0 }
 0x2ac   : > { %v3057_v33 = vpack.c.bf16 %v2570_v0, %v2569_v63  ;;  %v2572_v3 = vmax.f32 %v3081_v1, 0.0  ;;  %v2184_v1 = vadd.f32 %v4449_v16, %v4493_v48 }
 0x2ae   : > { %2697 = vst [vmem:[%s4506_s11] sm:$0xff] %v3057_v33  ;;  %v3058_v7 = vpack.c.bf16 %v2572_v3, %v2571_v2  ;;  %v2500_v61 = vpop.f32.mrb[36].mxu0  ;;  %v2186_v33 = vadd.f32 %v4451_v17, %v4491_v47  ;;  %v2192_v17 = vadd.f32 %v4455_v20, %v4491_v47 }
 0x2af   : > { %v3083_v9 = vadd.f32 %v2500_v61, %v2162_v4  ;;  %v2502_v25 = vpop.f32.mrb[37].mxu0 }
 0x2b0   : > { %2698 = vst [vmem:[%s4506_s11 + $0x8] sm:$0xff] %v3058_v7  ;;  %v3085_v22 = vadd.f32 %v2502_v25, %v2164_v5  ;;  %v2504_v42 = vpop.f32.mrb[38].mxu0  ;;  %v2188_v5 = vadd.f32 %v4453_v18, %v4493_v48 }
 0x2b1   : > { %v2573_v43 = vmax.f32 %v3083_v9, 0.0  ;;  %v3087_v6 = vadd.f32 %v2504_v42, %v2166_v56  ;;  %v2506_v21 = vpop.f32.mrb[39].mxu0 }
 0x2b2   : > { %v2574_v19 = vmax.f32 %v3085_v22, 0.0  ;;  %v3089_v14 = vadd.f32 %v2506_v21, %v2168_v10  ;;  %v2196_v21 = vadd.f32 %v4459_v23, %v4491_v47  ;;  %v2202_v23 = vadd.f32 %v4463_v13, %v4491_v47 }
 0x2b3   : > { %v2575_v55 = vmax.f32 %v3087_v6, 0.0 }
 0x2b4   : > { %v3059_v35 = vpack.c.bf16 %v2574_v19, %v2573_v43  ;;  %v2576_v45 = vmax.f32 %v3089_v14, 0.0  ;;  %v2194_v43 = vadd.f32 %v4457_v53, %v4493_v48 }
 0x2b6   : > { %2699 = vst [vmem:[%s4506_s11 + $0x10] sm:$0xff] %v3059_v35  ;;  %v3060_v58 = vpack.c.bf16 %v2576_v45, %v2575_v55  ;;  %v2510_v49 = vpop.f32.mrb[40].mxu0  ;;  %v2198_v55 = vadd.f32 %v4461_v24, %v4493_v48 }
 0x2b7   : > { %v3091_v51 = vadd.f32 %v2510_v49, %v2172_v41  ;;  %v2512_v8 = vpop.f32.mrb[41].mxu0 }
 0x2b8   : > { %2700 = vst [vmem:[%s4506_s11 + $0x18] sm:$0xff] %v3060_v58  ;;  %v3093_v54 = vadd.f32 %v2512_v8, %v2174_v46  ;;  %v2514_v31 = vpop.f32.mrb[42].mxu0  ;;  %v2204_v8 = vadd.f32 %v4465_v26, %v4493_v48 }
 0x2b9   : > { %v2577_v32 = vmax.f32 %v3091_v51, 0.0  ;;  %v3095_v12 = vadd.f32 %v2514_v31, %v2176_v50  ;;  %v2516_v59 = vpop.f32.mrb[43].mxu0 }
 0x2ba   : > { %v2578_v57 = vmax.f32 %v3093_v54, 0.0  ;;  %v3097_v63 = vadd.f32 %v2516_v59, %v2178_v52  ;;  %v2206_v54 = vadd.f32 %v4467_v44, %v4491_v47  ;;  %v2212_v44 = vadd.f32 %v4471_v28, %v4491_v47 }
 0x2bb   : > { %v2579_v60 = vmax.f32 %v3095_v12, 0.0  ;;  %v2208_v12 = vadd.f32 %v4469_v27, %v4493_v48 }
 0x2bc   : > { %v3061_v62 = vpack.c.bf16 %v2578_v57, %v2577_v32  ;;  %v2580_v0 = vmax.f32 %v3097_v63, 0.0 }
 0x2be   : > { %2701 = vst [vmem:[%s4506_s11 + $0x20] sm:$0xff] %v3061_v62  ;;  %v3062_v30 = vpack.c.bf16 %v2580_v0, %v2579_v60  ;;  %v2520_v2 = vpop.f32.mrb[44].mxu0 }
 0x2bf   : > { %v3099_v3 = vadd.f32 %v2520_v2, %v2182_v40  ;;  %v2522_v4 = vpop.f32.mrb[45].mxu0 }
 0x2c0   : > { %2702 = vst [vmem:[%s4506_s11 + $0x28] sm:$0xff] %v3062_v30  ;;  %v3101_v7 = vadd.f32 %v2522_v4, %v2184_v1  ;;  %v2524_v61 = vpop.f32.mrb[46].mxu0  ;;  %v2214_v30 = vadd.f32 %v4473_v29, %v4493_v48 }
 0x2c1   : > { %v2581_v56 = vmax.f32 %v3099_v3, 0.0  ;;  %v3103_v15 = vadd.f32 %v2524_v61, %v2186_v33  ;;  %v2526_v9 = vpop.f32.mrb[47].mxu0  ;;  %v2216_v33 = vadd.f32 %v4475_v34, %v4491_v47  ;;  %v2222_v34 = vadd.f32 %v4479_v37, %v4491_v47 }
 0x2c2   : > { %v2582_v16 = vmax.f32 %v3101_v7, 0.0  ;;  %v3105_v25 = vadd.f32 %v2526_v9, %v2188_v5  ;;  %v2218_v5 = vadd.f32 %v4477_v36, %v4493_v48  ;;  %v2224_v36 = vadd.f32 %v4481_v38, %v4493_v48 }
 0x2c3   : > { %v2583_v10 = vmax.f32 %v3103_v15, 0.0 }
 0x2c4   : > { %v3063_v22 = vpack.c.bf16 %v2582_v16, %v2581_v56  ;;  %v2584_v42 = vmax.f32 %v3105_v25, 0.0 }
 0x2c6   : > { %2703 = vst [vmem:[%s4506_s11 + $0x30] sm:$0xff] %v3063_v22  ;;  %v3064_v18 = vpack.c.bf16 %v2584_v42, %v2583_v10  ;;  %v2530_v6 = vpop.f32.mrb[48].mxu0 }
 0x2c7   : > { %v3107_v19 = vadd.f32 %v2530_v6, %v2192_v17  ;;  %v2532_v14 = vpop.f32.mrb[49].mxu0  ;;  %v2226_v17 = vadd.f32 %v4483_v39, %v4491_v47  ;;  %v2228_v6 = vadd.f32 %v4485_v11, %v4493_v48 }
 0x2c8   : > { %2704 = vst [vmem:[%s4506_s11 + $0x38] sm:$0xff] %v3064_v18  ;;  %v3109_v35 = vadd.f32 %v2532_v14, %v2194_v43  ;;  %v2534_v45 = vpop.f32.mrb[50].mxu0 }
 0x2c9   : > { %v2585_v41 = vmax.f32 %v3107_v19, 0.0  ;;  %v3111_v20 = vadd.f32 %v2534_v45, %v2196_v21  ;;  %v2536_v46 = vpop.f32.mrb[51].mxu0 }
 0x2ca   : > { %v2586_v53 = vmax.f32 %v3109_v35, 0.0  ;;  %v3113_v58 = vadd.f32 %v2536_v46, %v2198_v55 }
 0x2cb   : > { %v2587_v49 = vmax.f32 %v3111_v20, 0.0 }
 0x2cc   : > { %v3065_v50 = vpack.c.bf16 %v2586_v53, %v2585_v41  ;;  %v2588_v51 = vmax.f32 %v3113_v58, 0.0 }
 0x2ce   : > { %2705 = vst [vmem:[%s4506_s11 + $0x40] sm:$0xff] %v3065_v50  ;;  %v3066_v24 = vpack.c.bf16 %v2588_v51, %v2587_v49  ;;  %v2540_v52 = vpop.f32.mrb[52].mxu0 }
 0x2cf   : > { %v3115_v31 = vadd.f32 %v2540_v52, %v2202_v23  ;;  %v2542_v32 = vpop.f32.mrb[53].mxu0 }
 0x2d0   : > { %2706 = vst [vmem:[%s4506_s11 + $0x48] sm:$0xff] %v3066_v24  ;;  %v3117_v59 = vadd.f32 %v2542_v32, %v2204_v8  ;;  %v2544_v57 = vpop.f32.mrb[54].mxu0 }
 0x2d1   : > { %v2589_v63 = vmax.f32 %v3115_v31, 0.0  ;;  %v3119_v13 = vadd.f32 %v2544_v57, %v2206_v54  ;;  %v2546_v60 = vpop.f32.mrb[55].mxu0 }
 0x2d2   : > { %v2590_v26 = vmax.f32 %v3117_v59, 0.0  ;;  %v3121_v62 = vadd.f32 %v2546_v60, %v2208_v12 }
 0x2d3   : > { %v2591_v0 = vmax.f32 %v3119_v13, 0.0 }
 0x2d4   : > { %v3067_v40 = vpack.c.bf16 %v2590_v26, %v2589_v63  ;;  %v2592_v1 = vmax.f32 %v3121_v62, 0.0 }
 0x2d6   : > { %2707 = vst [vmem:[%s4506_s11 + $0x50] sm:$0xff] %v3067_v40  ;;  %v3068_v27 = vpack.c.bf16 %v2592_v1, %v2591_v0  ;;  %v2550_v2 = vpop.f32.mrb[56].mxu0 }
 0x2d7   : > { %v3123_v3 = vadd.f32 %v2550_v2, %v2212_v44  ;;  %v2552_v4 = vpop.f32.mrb[57].mxu0 }
 0x2d8   : > { %2708 = vst [vmem:[%s4506_s11 + $0x58] sm:$0xff] %v3068_v27  ;;  %v3125_v7 = vadd.f32 %v2552_v4, %v2214_v30  ;;  %v2554_v28 = vpop.f32.mrb[58].mxu0 }
 0x2d9   : > { %v2593_v61 = vmax.f32 %v3123_v3, 0.0  ;;  %v3127_v56 = vadd.f32 %v2554_v28, %v2216_v33  ;;  %v2556_v29 = vpop.f32.mrb[59].mxu0 }
 0x2da   : > { %v2594_v15 = vmax.f32 %v3125_v7, 0.0  ;;  %v3129_v9 = vadd.f32 %v2556_v29, %v2218_v5 }
 0x2db   : > { %v2595_v16 = vmax.f32 %v3127_v56, 0.0 }
 0x2dc   : > { %v3069_v25 = vpack.c.bf16 %v2594_v15, %v2593_v61  ;;  %v2596_v10 = vmax.f32 %v3129_v9, 0.0 }
 0x2de   : > { %2709 = vst [vmem:[%s4506_s11 + $0x60] sm:$0xff] %v3069_v25  ;;  %v3070_v22 = vpack.c.bf16 %v2596_v10, %v2595_v16  ;;  %v2560_v42 = vpop.f32.mrb[60].mxu0 }
 0x2df   : > { %v3131_v43 = vadd.f32 %v2560_v42, %v2222_v34  ;;  %v2562_v18 = vpop.f32.mrb[61].mxu0 }
 0x2e0   : > { %2710 = vst [vmem:[%s4506_s11 + $0x68] sm:$0xff] %v3070_v22  ;;  %v3133_v21 = vadd.f32 %v2562_v18, %v2224_v36  ;;  %v2564_v37 = vpop.f32.mrb[62].mxu0 }
 0x2e1   : > { %v2597_v38 = vmax.f32 %v3131_v43, 0.0  ;;  %v3135_v19 = vadd.f32 %v2564_v37, %v2226_v17  ;;  %v2566_v14 = vpop.f32.mrb[63].mxu0 }
 0x2e2   : > { %v2598_v55 = vmax.f32 %v3133_v21, 0.0  ;;  %v3137_v35 = vadd.f32 %v2566_v14, %v2228_v6 }
 0x2e3   : > { %v2599_v39 = vmax.f32 %v3135_v19, 0.0 }
 0x2e4   : > { %v3071_v47 = vpack.c.bf16 %v2598_v55, %v2597_v38  ;;  %v2600_v45 = vmax.f32 %v3137_v35, 0.0 }
 0x2e6   : > { %2711 = vst [vmem:[%s4506_s11 + $0x70] sm:$0xff] %v3071_v47  ;;  %v3072_v11 = vpack.c.bf16 %v2600_v45, %v2599_v39 }
 0x2e8   : > { %2712 = vst [vmem:[%s4506_s11 + $0x78] sm:$0xff] %v3072_v11 }
 0x2e9   : > { %3489 = shalt.err (!%p3486_p7)
}
 0x2ea   : > { %s3490_s0 = scalar_lea.hbm %s4580_s24, 2048  ;;  %s3494_s5 = scalar_lea.hbm %s4644_s4, 8192 }
 0x2eb   : > { %p3491_p9 = scmp.ne.s32.totalorder %s4580_s24, %s3490_s0  ;;  %p3495_p12 = scmp.lt.u32.totalorder %s4580_s24, %s4644_s4 }
 0x2ec   : > { %p3496_p13 = scmp.lt.u32.totalorder %s3494_s5, %s3490_s0  ;;  %p3498_p1 = scmp.lt.u32.totalorder %s3490_s0, %s4580_s24 }
 0x2ed   : > { %p3492_p10 = pnand %p3491_p9, %p3652_p3 }
 0x2ee   : > { %p3497_p0 = por %p3496_p13, %p3495_p12 }
 0x2ef   : > { %p3493_p11 = pneg %p3492_p10 }
 0x2f0   : > { %p3499_p2 = por %p3498_p1, %p3497_p0 }
 0x2f2   : > { %p3500_p4 = pnand %p3499_p2, %p3493_p11 }
 0x2f4   : > { %3503 = shalt.err (!%p3500_p4)
}
 0x2f5   : > { %s3574_s18 = smov 128   ;;  %s3575_s13 = smov 8  }
 0x2f6   : > { %3202 = dma.vmem_to_hbm [thread:$0]  (%p3652_p3), %s4582_s19, 2048, %s4580_s24, %s4588_s27, %s3574_s18, %s3574_s18, %s3575_s13  }
 0x2f7 PF: > { %p3208_p5 = scmp.ge.s32.totalorder %s3570_s22, 2  ;;  %s2745_s23 = sand.u32 1, %s3542_s15  }
 0x2f8   : > { %s2746_s30 = scalar_lea.sflag [#allocation3], %s2745_s23 }
 0x2f9   : > { %p3205_p6 = pnand %p3208_p5, %p3661_p8 }
 0x2fb   : > { %3537 = dma.done.wait (!%p3205_p6), %s2746_s30, 2048  }
 0x2fc   : > { %3539 = vsyncadd (!%p3205_p6), %s2746_s30, 4294965248  ;;  %s17_s22 = sadd.s32 1, %s3570_s22   ;;  %s4649_s15 = smov %s3546_s16 }
 0x2fd   : > { %p14_p7 = scmp.ge.s32.totalorder %s17_s22, 6   ;;  %s4650_s16 = smov %s3550_s17 }
 0x2fe   : > { %s4651_s17 = smov %s3670_s7  ;;  %s4652_s18 = smov %s3562_s20 }
 0x2ff   : > { %s4653_s19 = smov %s3566_s21  ;;  %s4654_s20 = smov %s4657_s25 }
 0x300   : > { %s4655_s21 = smov %s4661_s26  ;;  %16 = sbr.rel (!%p14_p7) target bundleno = 7 (0x7), region = 74 }
 0x307   :  { %2751 = vsyncpa [#allocation3], 1 }
 0x308   :  { %2753 = vsyncpa [#allocation3 + $0x1], 1 }

</bundles_post_ra>
